<compile_context>
chip_gen: v5e
topology: v5e:2x2
jax: 0.10.0
libtpu: 0.0.40
codegen_flags: <defaults>
</compile_context>

<pallas_src>
import functools

import numpy as np
import jax
import jax.numpy as jnp
from jax.experimental import pallas as pl
from jax.experimental.pallas import tpu as pltpu


# ---- map-constant channel indices (mirrors home_robot MC) --------------------------
NON_SEM_CHANNELS = 4
OBSTACLE_MAP = 0
EXPLORED_MAP = 1
CURRENT_LOCATION = 2
VISITED_MAP = 3
BEEN_CLOSE_MAP = 4
SEM_OFFSET = 2 * NON_SEM_CHANNELS  # semantic categories start at this channel


def disk(radius: int) -> np.ndarray:
    """skimage.morphology.disk(radius) as float32 0/1 array of shape (2r+1, 2r+1)."""
    y, x = np.mgrid[-radius:radius + 1, -radius:radius + 1]
    return (x * x + y * y <= radius * radius).astype(np.float32)


def _round_up(x: int, m: int) -> int:
    return ((x + m - 1) // m) * m


# ---- Pallas kernel ------------------------------------------------------------------
def _make_kernel(M: int, R: int, OFF_R: int, OFF_C: int, Mp_r: int, Mp_c: int):
    # Per-row half-widths of disk(R): |dx| <= floor(sqrt(R^2 - dy^2)).
    widths = [int(np.floor(np.sqrt(R * R - d * d))) for d in range(R + 1)]
    dys_for_width = {}
    for d, w in enumerate(widths):
        dys_for_width.setdefault(w, []).append(d)

    def kernel(cat_sref,          # scalar-prefetch: goal_category (SMEM), used by index_maps
               cat_ref,           # (1, 1, M, M) selected semantic channel
               exp_ref,           # (1, 1, M, M) explored / been-close channel
               obs_ref,           # (1, 1, M, M) obstacle channel
               goal_ref,          # out (1, M, M)
               found_ref,         # out (1, 1, 1)
               pad_ref):          # scratch VMEM (Mp_r, Mp_c) padded frame
        del cat_sref

        # --- reach_goal_if_in_map -------------------------------------------------
        cat_map = cat_ref[0, 0, :, :]
        is_goal = (cat_map == 1.0).astype(jnp.float32)
        found = jnp.sum(is_goal) > 0.0
        found_ref[...] = jnp.broadcast_to(found.astype(jnp.float32), (1, 1, 1))

        @pl.when(found)
        def _():
            goal_ref[0] = is_goal

        # --- get_frontier_map / explore_otherwise (only when goal not in map) ------
        @pl.when(jnp.logical_not(found))
        def _():
            # z = 1 - frontier_map = (explored != 0), embedded in a zero-padded frame.
            z = (exp_ref[0, 0, :, :] != 0.0).astype(jnp.float32)
            pad_ref[OFF_R:OFF_R + M, OFF_C:OFF_C + M] = z

            # Compile-time interior mask: stale halo contents never matter, so the
            # scratch is never zeroed and iterations stay independent (parallel-safe).
            row = jax.lax.broadcasted_iota(jnp.int32, (Mp_r, Mp_c), 0)
            col = jax.lax.broadcasted_iota(jnp.int32, (Mp_r, Mp_c), 1)
            interior = ((row >= OFF_R) & (row < OFF_R + M)
                        & (col >= OFF_C) & (col < OFF_C + M))
            P = jnp.where(interior, pad_ref[...], 0.0)

            # Binary dilation with disk(R), max-based and separable per disk row:
            #   - horizontal half-width-k dilations built incrementally from rolls of P
            #   - combined across row offsets +-d with sublane rolls.
            # Rolling the zero-halo frame by +-s and maxing both directions makes the
            # result independent of the roll sign convention (wrap brings only zeros).
            cur = P                      # horizontal dilation of half-width k (k = 0)
            V = None                     # accumulated 2-D dilation
            for k in range(R + 1):
                if k > 0:
                    h_pos = pltpu.roll(P, k, axis=1)
                    h_neg = pltpu.roll(P, Mp_c - k, axis=1)
                    cur = jnp.maximum(cur, jnp.maximum(h_pos, h_neg))
                for d in dys_for_width.get(k, ()):
                    if d == 0:
                        contrib = cur
                    else:
                        v_pos = pltpu.roll(cur, d, axis=0)
                        v_neg = pltpu.roll(cur, Mp_r - d, axis=0)
                        contrib = jnp.maximum(v_pos, v_neg)
                    V = contrib if V is None else jnp.maximum(V, contrib)

            # fmap2 = 1 - dilation(1 - fmap); zero outside the map (conv zero-padding).
            fmap2 = jnp.where(interior, 1.0 - V, 0.0)

            # border = dilation_disk1(fmap2) - fmap2   (disk(1) == 3x3 cross, 5 taps)
            cross = jnp.maximum(
                jnp.maximum(pltpu.roll(fmap2, 1, axis=1),
                            pltpu.roll(fmap2, Mp_c - 1, axis=1)),
                jnp.maximum(pltpu.roll(fmap2, 1, axis=0),
                            pltpu.roll(fmap2, Mp_r - 1, axis=0)))
            border = jnp.maximum(cross, fmap2) - fmap2

            # Extract the map interior through the scratch ref (static ref slice).
            pad_ref[...] = border
            frontier = pad_ref[OFF_R:OFF_R + M, OFF_C:OFF_C + M]
            goal_ref[0] = jnp.where(obs_ref[0, 0, :, :] > 0.0, 0.0, frontier)

    return kernel


@functools.lru_cache(maxsize=None)
def _build_policy_call(B: int, M: int, explored_channel: int, dilation_radius: int):
    R = int(dilation_radius)
    OFF_R = _round_up(R, 8)                      # sublane-aligned interior row offset
    OFF_C = R
    Mp_r = _round_up(OFF_R + M + R, 8)           # frame aligned to (8, 128) tiles
    Mp_c = _round_up(OFF_C + M + R, 128)
    kernel = _make_kernel(M, R, OFF_R, OFF_C, Mp_r, Mp_c)

    grid_spec = pltpu.PrefetchScalarGridSpec(
        num_scalar_prefetch=1,            # goal_category lands in SMEM, used by index_maps
        grid=(B,),
        in_specs=[
            # data-dependent semantic-channel selection via scalar prefetch
            pl.BlockSpec((1, 1, M, M), lambda b, cat: (b, cat[b] + SEM_OFFSET, 0, 0)),
            pl.BlockSpec((1, 1, M, M), lambda b, cat: (b, explored_channel, 0, 0)),
            pl.BlockSpec((1, 1, M, M), lambda b, cat: (b, OBSTACLE_MAP, 0, 0)),
        ],
        out_specs=[
            pl.BlockSpec((1, M, M), lambda b, cat: (b, 0, 0)),
            pl.BlockSpec((1, 1, 1), lambda b, cat: (b, 0, 0)),
        ],
        scratch_shapes=[
            pltpu.VMEM((Mp_r, Mp_c), jnp.float32),
        ],
    )
    call = pl.pallas_call(
        kernel,
        out_shape=(
            jax.ShapeDtypeStruct((B, M, M), jnp.float32),
            jax.ShapeDtypeStruct((B, 1, 1), jnp.float32),
        ),
        grid_spec=grid_spec,
        # batch elements are independent -> shardable across v7x's 2 TensorCores
        compiler_params=pltpu.CompilerParams(dimension_semantics=("parallel",)),
    )
    # TODO(synk): bf16 intermediates (v6e/v7x) and row-strip tiling for M>=960 on v7x
    # VMEM are not applied here; values are exactly 0/1 so they would be exact.
    return jax.jit(call)


# ---- policy wrapper (glue in plain JAX) ---------------------------------------------
class ObjectNavFrontierExplorationPolicyPallas:
    def __init__(self, exploration_strategy="seen_frontier",
                 explored_area_dilation_radius=10, explored_area_erosion_radius=5):
        assert exploration_strategy in ("seen_frontier", "been_close_to_frontier")
        self.exploration_strategy = exploration_strategy
        self.explored_area_dilation_radius = int(explored_area_dilation_radius)
        # deterministic, non-trainable buffers (same construction as the PyTorch module)
        self.dilate_explored_kernel = disk(explored_area_dilation_radius)
        self.erosion_explored_kernel = disk(explored_area_erosion_radius)  # unused in forward (parity)
        self.select_border_kernel = disk(1)

    @property
    def goal_update_steps(self):
        return 1

    def reach_single_category(self, map_features, category):
        B, C, M, _ = map_features.shape
        explored_ch = (EXPLORED_MAP if self.exploration_strategy == "seen_frontier"
                       else BEEN_CLOSE_MAP)
        call = _build_policy_call(int(B), int(M), int(explored_ch),
                                  self.explored_area_dilation_radius)
        goal_map, found = call(jnp.asarray(category, dtype=jnp.int32),
                               map_features, map_features, map_features)
        found_goal = found.reshape(B) > 0.5
        return goal_map, found_goal

    def forward(self, map_features, object_category=None, start_recep_category=None,
                end_recep_category=None, nav_to_recep=None):
        assert object_category is not None or end_recep_category is not None
        if object_category is not None and start_recep_category is not None:
            # TODO(synk): object+receptacle combination branch (reach_object_recep_combination
            # and the nav_to_recep blend) not ported to Pallas here.
            raise NotImplementedError("object + receptacle combination branch not implemented")
        goal_category = object_category if object_category is not None else end_recep_category
        return self.reach_single_category(map_features, goal_category)

    __call__ = forward


# ---- pure numpy reference (for correctness check) -----------------------------------
def _reference_forward(policy, map_features, category):
    mf = np.asarray(map_features)
    cat = np.asarray(category)
    B, C, M, _ = mf.shape
    goal_map = np.zeros((B, M, M), np.float32)
    found = np.zeros((B,), bool)
    for e in range(B):
        cm = mf[e, cat[e] + SEM_OFFSET]
        if (cm == 1).sum() > 0:
            goal_map[e] = (cm == 1).astype(np.float32)
            found[e] = True

    ch = EXPLORED_MAP if policy.exploration_strategy == "seen_frontier" else BEEN_CLOSE_MAP
    fmap = (mf[:, ch] == 0).astype(np.float32)

    def conv_same(x, k):
        p = k.shape[0] // 2
        xp = np.pad(x, ((0, 0), (p, p), (p, p)))
        out = np.zeros_like(x)
        for i in range(k.shape[0]):
            for j in range(k.shape[1]):
                out += k[i, j] * xp[:, i:i + x.shape[1], j:j + x.shape[2]]
        return out

    fmap2 = 1.0 - np.clip(conv_same(1.0 - fmap, policy.dilate_explored_kernel), 0.0, 1.0)
    frontier = np.clip(conv_same(fmap2, policy.select_border_kernel), 0.0, 1.0) - fmap2
    frontier[mf[:, OBSTACLE_MAP] > 0] = 0.0
    for e in range(B):
        if not found[e]:
            goal_map[e] = frontier[e]
    return goal_map, found


if __name__ == "__main__":
    B, num_sem, M = 2, 4, 16
    C = SEM_OFFSET + num_sem  # 12 channels: 2*NON_SEM_CHANNELS + num_sem_categories

    key = jax.random.PRNGKey(0)
    # binary semantic-map-style features
    map_features = (jax.random.uniform(key, (B, C, M, M)) > 0.7).astype(jnp.float32)
    object_category = jnp.array([0, 2], dtype=jnp.int32)

    # batch element 0: goal category 0 present in the map  -> "found goal" path
    map_features = map_features.at[0, 0 + SEM_OFFSET, 3, 4].set(1.0)
    # batch element 1: goal category 2 absent              -> frontier-exploration path
    map_features = map_features.at[1, 2 + SEM_OFFSET].set(0.0)
    # give element 1 a structured explored map (only a small corner explored) so the
    # frontier after disk(10) dilation is non-trivial on a 16x16 map
    map_features = map_features.at[1, EXPLORED_MAP].set(0.0)
    map_features = map_features.at[1, EXPLORED_MAP, 0:3, 0:3].set(1.0)

    policy = ObjectNavFrontierExplorationPolicyPallas("seen_frontier")

    goal_map, found_goal = policy(map_features, object_category=object_category)
    goal_map = jax.block_until_ready(goal_map)
    found_goal = jax.block_until_ready(found_goal)

    ref_goal, ref_found = _reference_forward(policy, map_features, object_category)
    np.testing.assert_allclose(np.asarray(goal_map), ref_goal, atol=1e-5)
    np.testing.assert_array_equal(np.asarray(found_goal), ref_found)

    print("KERNEL_OK")
</pallas_src>

<mosaic_0001>
module attributes {stable_mosaic.version = 11 : i64} {
  func.func @kernel(%arg0: i32, %arg1: memref<2xi32, #tpu.memory_space<smem>>, %arg2: memref<1x1x16x16xf32, #tpu.memory_space<vmem>>, %arg3: memref<1x1x16x16xf32, #tpu.memory_space<vmem>>, %arg4: memref<1x1x16x16xf32, #tpu.memory_space<vmem>>, %arg5: memref<1x16x16xf32, #tpu.memory_space<vmem>>, %arg6: memref<1x1x1xf32, #tpu.memory_space<vmem>>, %arg7: memref<48x128xf32, #tpu.memory_space<vmem>>) attributes {dimension_semantics = [#tpu.dimension_semantics<parallel>], iteration_bounds = array<i64: 2>, scalar_prefetch = 1 : i64, scratch_operands = 1 : i64, tpu.core_type = #tpu.core_type<tc>, window_params = [{transform_indices = @transform_0, window_bounds = array<i64: 1, 1, 16, 16>}, {transform_indices = @transform_1, window_bounds = array<i64: 1, 1, 16, 16>}, {transform_indices = @transform_2, window_bounds = array<i64: 1, 1, 16, 16>}, {transform_indices = @transform_3, window_bounds = array<i64: 1, 16, 16>}, {transform_indices = @transform_4, window_bounds = array<i64: 1, 1, 1>}]} {
    %c0 = arith.constant 0 : index
    %c0_0 = arith.constant 0 : index
    %c0_1 = arith.constant 0 : index
    %c0_2 = arith.constant 0 : index
    %0 = vector.load %arg2[%c0, %c0_0, %c0_1, %c0_2] : memref<1x1x16x16xf32, #tpu.memory_space<vmem>>, vector<1x1x16x16xf32>
    %1 = vector.shape_cast %0 : vector<1x1x16x16xf32> to vector<16x16xf32>
    %cst = arith.constant 1.000000e+00 : f32
    %2 = vector.broadcast %cst : f32 to vector<16x16xf32>
    %3 = arith.cmpf oeq, %1, %2 : vector<16x16xf32>
    %4 = arith.extui %3 : vector<16x16xi1> to vector<16x16xi32>
    %5 = arith.sitofp %4 : vector<16x16xi32> to vector<16x16xf32>
    %6 = vector.shape_cast %5 : vector<16x16xf32> to vector<1x16x16xf32>
    %cst_3 = arith.constant dense<0.000000e+00> : vector<1xf32>
    %7 = vector.multi_reduction <add>, %6, %cst_3 [1, 2] : vector<1x16x16xf32> to vector<1xf32>
    %8 = vector.shape_cast %7 : vector<1xf32> to vector<1x1x1xf32>
    %9 = vector.extract %8[0, 0, 0] : f32 from vector<1x1x1xf32>
    %cst_4 = arith.constant 0.000000e+00 : f32
    %10 = arith.cmpf ogt, %9, %cst_4 : f32
    %11 = arith.extui %10 : i1 to i32
    %12 = arith.sitofp %11 : i32 to f32
    %13 = vector.broadcast %12 : f32 to vector<1x1x1xf32>
    %c0_5 = arith.constant 0 : index
    %c0_6 = arith.constant 0 : index
    %c0_7 = arith.constant 0 : index
    %14 = vector.load %arg6[%c0_5, %c0_6, %c0_7] : memref<1x1x1xf32, #tpu.memory_space<vmem>>, vector<1x1x1xf32>
    tpu.vector_store %arg6[%c0_5, %c0_6, %c0_7], %13 {strides = array<i32>} : memref<1x1x1xf32, #tpu.memory_space<vmem>>, vector<1x1x1xf32>,
    %15 = arith.extui %10 : i1 to i32
    %c0_i32 = arith.constant 0 : i32
    %16 = arith.cmpi ne, %15, %c0_i32 : i32
    scf.if %16 {
      %c0_9 = arith.constant 0 : index
      %c0_10 = arith.constant 0 : index
      %c0_11 = arith.constant 0 : index
      %20 = vector.load %arg5[%c0_9, %c0_10, %c0_11] : memref<1x16x16xf32, #tpu.memory_space<vmem>>, vector<1x16x16xf32>
      %21 = vector.shape_cast %20 : vector<1x16x16xf32> to vector<16x16xf32>
      %22 = vector.shape_cast %5 : vector<16x16xf32> to vector<1x16x16xf32>
      tpu.vector_store %arg5[%c0_9, %c0_10, %c0_11], %22 {strides = array<i32>} : memref<1x16x16xf32, #tpu.memory_space<vmem>>, vector<1x16x16xf32>,
    } else {
    }
    %true = arith.constant true
    %17 = arith.xori %10, %true : i1
    %18 = arith.extui %17 : i1 to i32
    %c0_i32_8 = arith.constant 0 : i32
    %19 = arith.cmpi ne, %18, %c0_i32_8 : i32
    scf.if %19 {
      %c0_9 = arith.constant 0 : index
      %c0_10 = arith.constant 0 : index
      %c0_11 = arith.constant 0 : index
      %c0_12 = arith.constant 0 : index
      %20 = vector.load %arg3[%c0_9, %c0_10, %c0_11, %c0_12] : memref<1x1x16x16xf32, #tpu.memory_space<vmem>>, vector<1x1x16x16xf32>
      %21 = vector.shape_cast %20 : vector<1x1x16x16xf32> to vector<16x16xf32>
      %cst_13 = arith.constant 0.000000e+00 : f32
      %22 = vector.broadcast %cst_13 : f32 to vector<16x16xf32>
      %23 = arith.cmpf one, %21, %22 : vector<16x16xf32>
      %24 = arith.extui %23 : vector<16x16xi1> to vector<16x16xi32>
      %25 = arith.sitofp %24 : vector<16x16xi32> to vector<16x16xf32>
      %c16 = arith.constant 16 : index
      %c10 = arith.constant 10 : index
      %26 = vector.load %arg7[%c16, %c10] : memref<48x128xf32, #tpu.memory_space<vmem>>, vector<16x16xf32>
      tpu.vector_store %arg7[%c16, %c10], %25 {strides = array<i32>} : memref<48x128xf32, #tpu.memory_space<vmem>>, vector<16x16xf32>,
      %27 = tpu.iota {dimensions = array<i32: 0>} : vector<48x128xi32>
      %28 = tpu.iota {dimensions = array<i32: 1>} : vector<48x128xi32>
      %c16_i32 = arith.constant 16 : i32
      %29 = vector.broadcast %c16_i32 : i32 to vector<48x128xi32>
      %30 = arith.cmpi sge, %27, %29 : vector<48x128xi32>
      %c32_i32 = arith.constant 32 : i32
      %31 = vector.broadcast %c32_i32 : i32 to vector<48x128xi32>
      %32 = arith.cmpi slt, %27, %31 : vector<48x128xi32>
      %33 = arith.andi %30, %32 : vector<48x128xi1>
      %c10_i32 = arith.constant 10 : i32
      %34 = vector.broadcast %c10_i32 : i32 to vector<48x128xi32>
      %35 = arith.cmpi sge, %28, %34 : vector<48x128xi32>
      %36 = arith.andi %33, %35 : vector<48x128xi1>
      %c26_i32 = arith.constant 26 : i32
      %37 = vector.broadcast %c26_i32 : i32 to vector<48x128xi32>
      %38 = arith.cmpi slt, %28, %37 : vector<48x128xi32>
      %39 = arith.andi %36, %38 : vector<48x128xi1>
      %c0_14 = arith.constant 0 : index
      %c0_15 = arith.constant 0 : index
      %40 = vector.load %arg7[%c0_14, %c0_15] : memref<48x128xf32, #tpu.memory_space<vmem>>, vector<48x128xf32>
      %cst_16 = arith.constant 0.000000e+00 : f32
      %41 = vector.broadcast %cst_16 : f32 to vector<48x128xf32>
      %42 = arith.select %39, %40, %41 : vector<48x128xi1>, vector<48x128xf32>
      %c10_i32_17 = arith.constant 10 : i32
      %43 = tpu.dynamic_rotate %42 by %c10_i32_17 dim 0 : vector<48x128xf32>, i32 -> vector<48x128xf32>
      %c38_i32 = arith.constant 38 : i32
      %44 = tpu.dynamic_rotate %42 by %c38_i32 dim 0 : vector<48x128xf32>, i32 -> vector<48x128xf32>
      %45 = arith.maximumf %43, %44 : vector<48x128xf32>
      %c1_i32 = arith.constant 1 : i32
      %46 = tpu.dynamic_rotate %42 by %c1_i32 dim 1 : vector<48x128xf32>, i32 -> vector<48x128xf32>
      %c127_i32 = arith.constant 127 : i32
      %47 = tpu.dynamic_rotate %42 by %c127_i32 dim 1 : vector<48x128xf32>, i32 -> vector<48x128xf32>
      %48 = arith.maximumf %46, %47 : vector<48x128xf32>
      %49 = arith.maximumf %42, %48 : vector<48x128xf32>
      %c2_i32 = arith.constant 2 : i32
      %50 = tpu.dynamic_rotate %42 by %c2_i32 dim 1 : vector<48x128xf32>, i32 -> vector<48x128xf32>
      %c126_i32 = arith.constant 126 : i32
      %51 = tpu.dynamic_rotate %42 by %c126_i32 dim 1 : vector<48x128xf32>, i32 -> vector<48x128xf32>
      %52 = arith.maximumf %50, %51 : vector<48x128xf32>
      %53 = arith.maximumf %49, %52 : vector<48x128xf32>
      %c3_i32 = arith.constant 3 : i32
      %54 = tpu.dynamic_rotate %42 by %c3_i32 dim 1 : vector<48x128xf32>, i32 -> vector<48x128xf32>
      %c125_i32 = arith.constant 125 : i32
      %55 = tpu.dynamic_rotate %42 by %c125_i32 dim 1 : vector<48x128xf32>, i32 -> vector<48x128xf32>
      %56 = arith.maximumf %54, %55 : vector<48x128xf32>
      %57 = arith.maximumf %53, %56 : vector<48x128xf32>
      %c4_i32 = arith.constant 4 : i32
      %58 = tpu.dynamic_rotate %42 by %c4_i32 dim 1 : vector<48x128xf32>, i32 -> vector<48x128xf32>
      %c124_i32 = arith.constant 124 : i32
      %59 = tpu.dynamic_rotate %42 by %c124_i32 dim 1 : vector<48x128xf32>, i32 -> vector<48x128xf32>
      %60 = arith.maximumf %58, %59 : vector<48x128xf32>
      %61 = arith.maximumf %57, %60 : vector<48x128xf32>
      %c9_i32 = arith.constant 9 : i32
      %62 = tpu.dynamic_rotate %61 by %c9_i32 dim 0 : vector<48x128xf32>, i32 -> vector<48x128xf32>
      %c39_i32 = arith.constant 39 : i32
      %63 = tpu.dynamic_rotate %61 by %c39_i32 dim 0 : vector<48x128xf32>, i32 -> vector<48x128xf32>
      %64 = arith.maximumf %62, %63 : vector<48x128xf32>
      %65 = arith.maximumf %45, %64 : vector<48x128xf32>
      %c5_i32 = arith.constant 5 : i32
      %66 = tpu.dynamic_rotate %42 by %c5_i32 dim 1 : vector<48x128xf32>, i32 -> vector<48x128xf32>
      %c123_i32 = arith.constant 123 : i32
      %67 = tpu.dynamic_rotate %42 by %c123_i32 dim 1 : vector<48x128xf32>, i32 -> vector<48x128xf32>
      %68 = arith.maximumf %66, %67 : vector<48x128xf32>
      %69 = arith.maximumf %61, %68 : vector<48x128xf32>
      %c6_i32 = arith.constant 6 : i32
      %70 = tpu.dynamic_rotate %42 by %c6_i32 dim 1 : vector<48x128xf32>, i32 -> vector<48x128xf32>
      %c122_i32 = arith.constant 122 : i32
      %71 = tpu.dynamic_rotate %42 by %c122_i32 dim 1 : vector<48x128xf32>, i32 -> vector<48x128xf32>
      %72 = arith.maximumf %70, %71 : vector<48x128xf32>
      %73 = arith.maximumf %69, %72 : vector<48x128xf32>
      %c8_i32 = arith.constant 8 : i32
      %74 = tpu.dynamic_rotate %73 by %c8_i32 dim 0 : vector<48x128xf32>, i32 -> vector<48x128xf32>
      %c40_i32 = arith.constant 40 : i32
      %75 = tpu.dynamic_rotate %73 by %c40_i32 dim 0 : vector<48x128xf32>, i32 -> vector<48x128xf32>
      %76 = arith.maximumf %74, %75 : vector<48x128xf32>
      %77 = arith.maximumf %65, %76 : vector<48x128xf32>
      %c7_i32 = arith.constant 7 : i32
      %78 = tpu.dynamic_rotate %42 by %c7_i32 dim 1 : vector<48x128xf32>, i32 -> vector<48x128xf32>
      %c121_i32 = arith.constant 121 : i32
      %79 = tpu.dynamic_rotate %42 by %c121_i32 dim 1 : vector<48x128xf32>, i32 -> vector<48x128xf32>
      %80 = arith.maximumf %78, %79 : vector<48x128xf32>
      %81 = arith.maximumf %73, %80 : vector<48x128xf32>
      %c7_i32_18 = arith.constant 7 : i32
      %82 = tpu.dynamic_rotate %81 by %c7_i32_18 dim 0 : vector<48x128xf32>, i32 -> vector<48x128xf32>
      %c41_i32 = arith.constant 41 : i32
      %83 = tpu.dynamic_rotate %81 by %c41_i32 dim 0 : vector<48x128xf32>, i32 -> vector<48x128xf32>
      %84 = arith.maximumf %82, %83 : vector<48x128xf32>
      %85 = arith.maximumf %77, %84 : vector<48x128xf32>
      %c8_i32_19 = arith.constant 8 : i32
      %86 = tpu.dynamic_rotate %42 by %c8_i32_19 dim 1 : vector<48x128xf32>, i32 -> vector<48x128xf32>
      %c120_i32 = arith.constant 120 : i32
      %87 = tpu.dynamic_rotate %42 by %c120_i32 dim 1 : vector<48x128xf32>, i32 -> vector<48x128xf32>
      %88 = arith.maximumf %86, %87 : vector<48x128xf32>
      %89 = arith.maximumf %81, %88 : vector<48x128xf32>
      %c5_i32_20 = arith.constant 5 : i32
      %90 = tpu.dynamic_rotate %89 by %c5_i32_20 dim 0 : vector<48x128xf32>, i32 -> vector<48x128xf32>
      %c43_i32 = arith.constant 43 : i32
      %91 = tpu.dynamic_rotate %89 by %c43_i32 dim 0 : vector<48x128xf32>, i32 -> vector<48x128xf32>
      %92 = arith.maximumf %90, %91 : vector<48x128xf32>
      %93 = arith.maximumf %85, %92 : vector<48x128xf32>
      %c6_i32_21 = arith.constant 6 : i32
      %94 = tpu.dynamic_rotate %89 by %c6_i32_21 dim 0 : vector<48x128xf32>, i32 -> vector<48x128xf32>
      %c42_i32 = arith.constant 42 : i32
      %95 = tpu.dynamic_rotate %89 by %c42_i32 dim 0 : vector<48x128xf32>, i32 -> vector<48x128xf32>
      %96 = arith.maximumf %94, %95 : vector<48x128xf32>
      %97 = arith.maximumf %93, %96 : vector<48x128xf32>
      %c9_i32_22 = arith.constant 9 : i32
      %98 = tpu.dynamic_rotate %42 by %c9_i32_22 dim 1 : vector<48x128xf32>, i32 -> vector<48x128xf32>
      %c119_i32 = arith.constant 119 : i32
      %99 = tpu.dynamic_rotate %42 by %c119_i32 dim 1 : vector<48x128xf32>, i32 -> vector<48x128xf32>
      %100 = arith.maximumf %98, %99 : vector<48x128xf32>
      %101 = arith.maximumf %89, %100 : vector<48x128xf32>
      %c1_i32_23 = arith.constant 1 : i32
      %102 = tpu.dynamic_rotate %101 by %c1_i32_23 dim 0 : vector<48x128xf32>, i32 -> vector<48x128xf32>
      %c47_i32 = arith.constant 47 : i32
      %103 = tpu.dynamic_rotate %101 by %c47_i32 dim 0 : vector<48x128xf32>, i32 -> vector<48x128xf32>
      %104 = arith.maximumf %102, %103 : vector<48x128xf32>
      %105 = arith.maximumf %97, %104 : vector<48x128xf32>
      %c2_i32_24 = arith.constant 2 : i32
      %106 = tpu.dynamic_rotate %101 by %c2_i32_24 dim 0 : vector<48x128xf32>, i32 -> vector<48x128xf32>
      %c46_i32 = arith.constant 46 : i32
      %107 = tpu.dynamic_rotate %101 by %c46_i32 dim 0 : vector<48x128xf32>, i32 -> vector<48x128xf32>
      %108 = arith.maximumf %106, %107 : vector<48x128xf32>
      %109 = arith.maximumf %105, %108 : vector<48x128xf32>
      %c3_i32_25 = arith.constant 3 : i32
      %110 = tpu.dynamic_rotate %101 by %c3_i32_25 dim 0 : vector<48x128xf32>, i32 -> vector<48x128xf32>
      %c45_i32 = arith.constant 45 : i32
      %111 = tpu.dynamic_rotate %101 by %c45_i32 dim 0 : vector<48x128xf32>, i32 -> vector<48x128xf32>
      %112 = arith.maximumf %110, %111 : vector<48x128xf32>
      %113 = arith.maximumf %109, %112 : vector<48x128xf32>
      %c4_i32_26 = arith.constant 4 : i32
      %114 = tpu.dynamic_rotate %101 by %c4_i32_26 dim 0 : vector<48x128xf32>, i32 -> vector<48x128xf32>
      %c44_i32 = arith.constant 44 : i32
      %115 = tpu.dynamic_rotate %101 by %c44_i32 dim 0 : vector<48x128xf32>, i32 -> vector<48x128xf32>
      %116 = arith.maximumf %114, %115 : vector<48x128xf32>
      %117 = arith.maximumf %113, %116 : vector<48x128xf32>
      %c10_i32_27 = arith.constant 10 : i32
      %118 = tpu.dynamic_rotate %42 by %c10_i32_27 dim 1 : vector<48x128xf32>, i32 -> vector<48x128xf32>
      %c118_i32 = arith.constant 118 : i32
      %119 = tpu.dynamic_rotate %42 by %c118_i32 dim 1 : vector<48x128xf32>, i32 -> vector<48x128xf32>
      %120 = arith.maximumf %118, %119 : vector<48x128xf32>
      %121 = arith.maximumf %101, %120 : vector<48x128xf32>
      %122 = arith.maximumf %117, %121 : vector<48x128xf32>
      %cst_28 = arith.constant 1.000000e+00 : f32
      %123 = vector.broadcast %cst_28 : f32 to vector<48x128xf32>
      %124 = arith.subf %123, %122 : vector<48x128xf32>
      %cst_29 = arith.constant 0.000000e+00 : f32
      %125 = vector.broadcast %cst_29 : f32 to vector<48x128xf32>
      %126 = arith.select %39, %124, %125 : vector<48x128xi1>, vector<48x128xf32>
      %c1_i32_30 = arith.constant 1 : i32
      %127 = tpu.dynamic_rotate %126 by %c1_i32_30 dim 1 : vector<48x128xf32>, i32 -> vector<48x128xf32>
      %c127_i32_31 = arith.constant 127 : i32
      %128 = tpu.dynamic_rotate %126 by %c127_i32_31 dim 1 : vector<48x128xf32>, i32 -> vector<48x128xf32>
      %129 = arith.maximumf %127, %128 : vector<48x128xf32>
      %c1_i32_32 = arith.constant 1 : i32
      %130 = tpu.dynamic_rotate %126 by %c1_i32_32 dim 0 : vector<48x128xf32>, i32 -> vector<48x128xf32>
      %c47_i32_33 = arith.constant 47 : i32
      %131 = tpu.dynamic_rotate %126 by %c47_i32_33 dim 0 : vector<48x128xf32>, i32 -> vector<48x128xf32>
      %132 = arith.maximumf %130, %131 : vector<48x128xf32>
      %133 = arith.maximumf %129, %132 : vector<48x128xf32>
      %134 = arith.maximumf %133, %126 : vector<48x128xf32>
      %135 = arith.subf %134, %126 : vector<48x128xf32>
      %c0_34 = arith.constant 0 : index
      %c0_35 = arith.constant 0 : index
      %136 = vector.load %arg7[%c0_34, %c0_35] : memref<48x128xf32, #tpu.memory_space<vmem>>, vector<48x128xf32>
      tpu.vector_store %arg7[%c0_34, %c0_35], %135 {strides = array<i32>} : memref<48x128xf32, #tpu.memory_space<vmem>>, vector<48x128xf32>,
      %c16_36 = arith.constant 16 : index
      %c10_37 = arith.constant 10 : index
      %137 = vector.load %arg7[%c16_36, %c10_37] : memref<48x128xf32, #tpu.memory_space<vmem>>, vector<16x16xf32>
      %c0_38 = arith.constant 0 : index
      %c0_39 = arith.constant 0 : index
      %c0_40 = arith.constant 0 : index
      %c0_41 = arith.constant 0 : index
      %138 = vector.load %arg4[%c0_38, %c0_39, %c0_40, %c0_41] : memref<1x1x16x16xf32, #tpu.memory_space<vmem>>, vector<1x1x16x16xf32>
      %139 = vector.shape_cast %138 : vector<1x1x16x16xf32> to vector<16x16xf32>
      %cst_42 = arith.constant 0.000000e+00 : f32
      %140 = vector.broadcast %cst_42 : f32 to vector<16x16xf32>
      %141 = arith.cmpf ogt, %139, %140 : vector<16x16xf32>
      %cst_43 = arith.constant 0.000000e+00 : f32
      %142 = vector.broadcast %cst_43 : f32 to vector<16x16xf32>
      %143 = arith.select %141, %142, %137 : vector<16x16xi1>, vector<16x16xf32>
      %c0_44 = arith.constant 0 : index
      %c0_45 = arith.constant 0 : index
      %c0_46 = arith.constant 0 : index
      %144 = vector.load %arg5[%c0_44, %c0_45, %c0_46] : memref<1x16x16xf32, #tpu.memory_space<vmem>>, vector<1x16x16xf32>
      %145 = vector.shape_cast %144 : vector<1x16x16xf32> to vector<16x16xf32>
      %146 = vector.shape_cast %143 : vector<16x16xf32> to vector<1x16x16xf32>
      tpu.vector_store %arg5[%c0_44, %c0_45, %c0_46], %146 {strides = array<i32>} : memref<1x16x16xf32, #tpu.memory_space<vmem>>, vector<1x16x16xf32>,
    } else {
    }
    return
  }
  func.func @transform_0(%arg0: i32, %arg1: memref<2xi32, #tpu.memory_space<smem>>) -> (i32, i32, i32, i32) {
    %0 = arith.index_cast %arg0 : i32 to index
    %1 = memref.load %arg1[%0] : memref<2xi32, #tpu.memory_space<smem>>
    %c8_i32 = arith.constant 8 : i32
    %2 = arith.addi %1, %c8_i32 : i32
    %c0_i32 = arith.constant 0 : i32
    %c0_i32_0 = arith.constant 0 : i32
    %c0_i32_1 = arith.constant 0 : i32
    return %arg0, %2, %c0_i32, %c0_i32_0 : i32, i32, i32, i32
  }
  func.func @transform_1(%arg0: i32, %arg1: memref<2xi32, #tpu.memory_space<smem>>) -> (i32, i32, i32, i32) {
    %c1_i32 = arith.constant 1 : i32
    %c0_i32 = arith.constant 0 : i32
    %c0_i32_0 = arith.constant 0 : i32
    %c0_i32_1 = arith.constant 0 : i32
    return %arg0, %c1_i32, %c0_i32, %c0_i32_0 : i32, i32, i32, i32
  }
  func.func @transform_2(%arg0: i32, %arg1: memref<2xi32, #tpu.memory_space<smem>>) -> (i32, i32, i32, i32) {
    %c0_i32 = arith.constant 0 : i32
    %c0_i32_0 = arith.constant 0 : i32
    %c0_i32_1 = arith.constant 0 : i32
    %c0_i32_2 = arith.constant 0 : i32
    return %arg0, %c0_i32, %c0_i32_0, %c0_i32_1 : i32, i32, i32, i32
  }
  func.func @transform_3(%arg0: i32, %arg1: memref<2xi32, #tpu.memory_space<smem>>) -> (i32, i32, i32) {
    %c0_i32 = arith.constant 0 : i32
    %c0_i32_0 = arith.constant 0 : i32
    %c0_i32_1 = arith.constant 0 : i32
    return %arg0, %c0_i32, %c0_i32_0 : i32, i32, i32
  }
  func.func @transform_4(%arg0: i32, %arg1: memref<2xi32, #tpu.memory_space<smem>>) -> (i32, i32, i32) {
    %c0_i32 = arith.constant 0 : i32
    %c0_i32_0 = arith.constant 0 : i32
    %c0_i32_1 = arith.constant 0 : i32
    return %arg0, %c0_i32, %c0_i32_0 : i32, i32, i32
  }
}

</mosaic_0001>

<bundles_post_ra>
// kernel: tpu_custom_call.1
= control target key start
LH: loop header
LB: loop body
LE: loop exit
PB: predicated region body
PF: predicated region fallthrough
CT: control target
= control target key end

     0   :  { %s1899_s21 = smov [#allocation4]   ;;  %s2622_s0 = inlined_call_operand.hbm [shape: s32[2], index: 0, kind: input, shape index: {}]   ;;  %s2623_s1 = inlined_call_operand.hbm [shape: f32[2,12,16,16], index: 1, kind: input, shape index: {}]   ;;  %s2624_s2 = inlined_call_operand.hbm [shape: f32[2,12,16,16], index: 2, kind: input, shape index: {}]   ;;  %s2625_s3 = inlined_call_operand.hbm [shape: f32[2,12,16,16], index: 3, kind: input, shape index: {}]   ;;  %s2626_s4 = inlined_call_operand.hbm [shape: f32[2,16,16], index: 4, kind: output, shape index: {0}]   ;;  %s2627_s5 = inlined_call_operand.vmem [shape: f32[2,1,1], index: 5, kind: output, shape index: {1}]  }
   0x1   :  { %2644 = sst [smem:[#allocation26_spill]] %s2624_s2  ;;  %s12_s20 = sshll.u32 %s2622_s0, 4  ;;  %s13_s20 = int_to_ptr.hbm [resolvable:$true] %s12_s20 }
   0x2   :  { %2645 = sst [smem:[#allocation27_spill]] %s2625_s3 }
   0x3   :  { %2646 = sst [smem:[#allocation28_spill]] %s2626_s4 }
   0x4   :  { %2647 = sst [smem:[#allocation29_spill]] %s2627_s5 }
   0x5   :  { %15 = dma.hbm_to_smem %s13_s20, 16, %s1899_s21, [#allocation3] }
   0x6   :  { %1857 = dma.done.wait [#allocation3], 16 }
   0x7   :  { %1858 = vsyncadd [#allocation3], 4294967280 }
   0x8   :  { %18 = sfence }
   0x9   :  { %19 = vsyncpa [#allocation6], 0 }
   0xa   :  { %21 = vsyncpa [#allocation6 + $0x1], 0 }
   0xb   :  { %22 = vsyncpa [#allocation9], 0 }
   0xc   :  { %24 = vsyncpa [#allocation9 + $0x1], 0 }
   0xd   :  { %25 = vsyncpa [#allocation7], 0 }
   0xe   :  { %27 = vsyncpa [#allocation7 + $0x1], 0  ;;  %s1959_s22 = smov 0   ;;  %s1961_s23 = smov 0  }
   0xf   :  { %s1963_s24 = smov 0   ;;  %s1965_s25 = smov 0  }
  0x10   :  { %s1967_s0 = smov 0   ;;  %s1969_s26 = smov 0  }
  0x11   :  { %s1971_s27 = smov 0  }
  0x12 LB: > { %2648 = sst [smem:[#allocation18_spill]] %s1873_s22  ;;  %s1995_s28 = sadd.s32 4294967295, %s1897_s27   ;;  %s1897_s27 = sphi %s1971_s27, %s2684_s27   ;;  %s1893_s26 = sphi %s1969_s26, %s2692_s26   ;;  %s1889_s0 = sphi %s1967_s0, %s2691_s0   ;;  %s1885_s25 = sphi %s1965_s25, %s2690_s25   ;;  %s1881_s24 = sphi %s1963_s24, %s2686_s24   ;;  %s1877_s23 = sphi %s1961_s23, %s2689_s23   ;;  %s1873_s22 = sphi %s1959_s22, %s2688_s22  }
  0x13   : > { %2649 = sst [smem:[#allocation19_spill]] %s1881_s24  ;;  %s1405_s29 = sadd.s32 4294967294, %s1897_s27  }
  0x14   : > { %s1999_s30 = sadd.s32 1, %s1897_s27   ;;  %p54_p0 = scmp.eq.s32.totalorder %s1897_s27, 0 }
  0x15   : > { %2650 = sst [smem:[#allocation20_spill]] %s1999_s30  ;;  %s2004_s6 = ssub.s32 %s1897_s27, %s1999_s30 }
  0x16   : > { %p60_p1 = scmp.eq.s32.totalorder %s1995_s28, 0  ;;  %p70_p2 = scmp.eq.s32.totalorder %s2004_s6, 0 }
  0x17   : > { %s72_s7 = sadd.s32 1, %s1881_s24  ;;  %p79_p3 = scmp.ne.s32.totalorder %s1881_s24, %s1877_s23 }
  0x18   : > { %p85_p4 = scmp.ne.s32.totalorder %s1877_s23, %s1873_s22  ;;  %p135_p7 = scmp.eq.s32.totalorder %s1995_s28, 1 }
  0x19   : > { %s2014_s8 = scalar_select %p70_p2, %s1881_s24, %s72_s7  }
  0x1a   : > { %p2018_p5 = por %p79_p3, %p54_p0  ;;  %p2024_p6 = por %p85_p4, %p60_p1 }
  0x1b   : > { %2651 = sst [smem:[#allocation21_spill]] %s2014_s8  ;;  %p141_p8 = scmp.eq.s32.totalorder %s1405_s29, 1 }
  0x1c   : > { %p2630_p10 = scmp.lt.s32.totalorder %s1897_s27, 2  ;;  %p2031_p11 = por %p135_p7, %p79_p3 }
  0x1d   : > { %p2035_p12 = por %p141_p8, %p85_p4  ;;  %s213_s13 = sand.u32 1, %s1897_s27  }
  0x1e   : > { %s2654_s11 = scalar_select %p2031_p11, 1, 0 }
  0x1f   : > { %s2656_s12 = scalar_select %p2035_p12, 1, 0 }
  0x20   : > { %2655 = sst [smem:[#allocation22_spill]] %s2654_s11  ;;  %s215_s14 = sand.u32 1, %s1881_s24  }
  0x21   : > { %2657 = sst [smem:[#allocation23_spill]] %s2656_s12  ;;  %s2041_s15 = sshll.u32 %s215_s14, 4 }
  0x22   : > { %s2628_s16 = smul.u32 192, %s1897_s27  ;;  %s217_s17 = scalar_lea.vmem [#allocation8], %s2041_s15 }
  0x23   : > { %s226_s18 = sshll.u32 %s217_s17, 4  ;;  %p2049_p13 = pnand %p2630_p10, %p2018_p5  ;;  %s227_s18 = int_to_ptr.vmem [resolvable:$true] %s226_s18 }
  0x24   : > { %s2659_s2 = sld [smem:[#allocation26_spill]]  ;;  %s2058_s8 = scalar_lea.sflag [#allocation9], %s213_s13 }
  0x25   : > { %p1715_p3 = pneg %p2049_p13 }
  0x2a   : > { %s1314_s29 = scalar_lea.hbm %s2659_s2, %s2628_s16  ;;  %s1718_s16 = scalar_lea.hbm %s2659_s2, 384 }
  0x2b   : > { %s1315_s7 = scalar_lea.hbm %s1314_s29, 16 }
  0x2c   : > { %s224_s14 = sshll.u32 %s1315_s7, 4  ;;  %s225_s14 = int_to_ptr.hbm [resolvable:$true] %s224_s14 }
  0x2d   : > { %s1711_s17 = sshra.s32 %s225_s14, 4  ;;  %s1712_s17 = int_to_ptr.hbm [resolvable:$true] %s1711_s17 }
  0x2e   : > { %s1713_s9 = scalar_lea.hbm %s1712_s17, 16  ;;  %p1719_p7 = scmp.lt.s32.totalorder %s1712_s17, %s2659_s2 }
  0x2f   : > { %p1714_p2 = scmp.ne.s32.totalorder %s1712_s17, %s1713_s9  ;;  %p1720_p8 = scmp.lt.s32.totalorder %s1718_s16, %s1713_s9 }
  0x31   : > { %p1716_p4 = pnand %p1715_p3, %p1714_p2  ;;  %p1721_p9 = por %p1720_p8, %p1719_p7 }
  0x33   : > { %p1717_p5 = pneg %p1716_p4 }
  0x35   : > { %p1722_p10 = pnand %p1721_p9, %p1717_p5 }
  0x37   : > { %1725 = shalt.err (!%p1722_p10)
}
  0x38   : > { %s2631_s13 = smov 128   ;;  %s2633_s24 = smov 8  }
  0x39   : > { %1451 = dma.hbm_to_vmem [thread:$0]  (!%p2049_p13), %s225_s14, 256, %s227_s18, %s2058_s8, %s2631_s13, %s2631_s13, %s2633_s24  }
  0x3a   : > { %p1415_p9 = scmp.ge.s32.totalorder %s1897_s27, 1  ;;  %p256_p10 = scmp.lt.s32.totalorder %s1897_s27, 3 }
  0x3b   : > { %s37_s7 = sld [smem:[#allocation4 + %s1897_s27]]  ;;  %s240_s17 = scalar_lea.vmem [#allocation10], %s2041_s15 }
  0x3c   : > { %p2079_p2 = pnand %p1415_p9, %p256_p10  ;;  %s2085_s9 = sshll.u32 %s240_s17, 4 }
  0x3d   : > { %2661 = sst [smem:[#allocation24_spill]] %s2085_s9  ;;  %p53_p4 = scmp.ne.s32.totalorder %s1893_s26, %s1889_s0 }
  0x3e   : > { %s39_s20 = sld [smem:[#allocation4 + %s1999_s30]]  ;;  %p59_p5 = scmp.ne.s32.totalorder %s1889_s0, %s1885_s25 }
  0x3f   : > { %s46_s14 = sadd.s32 1, %s1893_s26  ;;  %p55_p8 = por %p54_p0, %p53_p4 }
  0x40   : > { %p2094_p7 = por %p60_p1, %p59_p5  ;;  %s2640_s29 = sand.u32 1, %s1893_s26  }
  0x41   : > { %s38_s21 = sadd.s32 8, %s37_s7  ;;  %p2663_p9 = scmp.lt.s32.totalorder %s1897_s27, 2 }
  0x42   : > { %s2665_s24 = smul.u32 192, %s1897_s27  ;;  %s2666_s3 = sld [smem:[#allocation27_spill]] }
  0x43   : > { %p2105_p10 = pnand %p2663_p9, %p55_p8  ;;  %p2668_p0 = pmov %p2663_p9 }
  0x44   : > { %s40_s15 = sadd.s32 8, %s39_s20  ;;  %s1408_s20 = sshll.u32 %s2640_s29, 4 }
  0x45   : > { %s42_s17 = ssub.s32 %s38_s21, %s40_s15  ;;  %p2669_p4 = pmov %p2668_p0 }
  0x46   : > { %s43_s25 = sor.u32 %s42_s17, %s2004_s6 }
  0x47   : > { %p44_p1 = scmp.eq.s32.totalorder %s43_s25, 0 }
  0x48   : > { %s245_s9 = scalar_lea.hbm %s2666_s3, %s2665_s24  ;;  %s1748_s24 = scalar_lea.hbm %s2666_s3, 384 }
  0x49   : > { %s1433_s12 = scalar_select %p55_p8, [#allocation4], [#allocation12] }
  0x4a   : > { %s2116_s7 = scalar_select %p44_p1, %s1893_s26, %s46_s14  }
  0x4b   : > { %s1434_s22 = scalar_select %p55_p8, %s1897_s27, 0 }
  0x4c   : > { %2667 = sst [smem:[#allocation25_spill]] %s2116_s7  ;;  %s2694_s12 = smov (!%p2668_p0, %s1433_s12), [#allocation13] }
  0x4d   : > { %s2696_s22 = smov (!%p2669_p4, %s1434_s22), 0  ;;  %s246_s21 = sshll.u32 %s245_s9, 4  ;;  %s247_s21 = int_to_ptr.hbm [resolvable:$true] %s246_s21 }
  0x4e   : > { %s192_s15 = sld [smem:[%s2694_s12 + %s2696_s22]]  ;;  %s1741_s6 = sshra.s32 %s247_s21, 4  ;;  %s1742_s6 = int_to_ptr.hbm [resolvable:$true] %s1741_s6 }
  0x4f   : > { %s1743_s17 = scalar_lea.hbm %s1742_s6, 16  ;;  %p1749_p8 = scmp.lt.s32.totalorder %s1742_s6, %s2666_s3 }
  0x50   : > { %p1744_p5 = scmp.ne.s32.totalorder %s1742_s6, %s1743_s17  ;;  %p1750_p1 = scmp.lt.s32.totalorder %s1748_s24, %s1743_s17 }
  0x52   : > { %p1746_p9 = pnand %p1744_p5, %p1715_p3  ;;  %p1751_p0 = por %p1750_p1, %p1749_p8 }
  0x54   : > { %p1747_p12 = pneg %p1746_p9 }
  0x56   : > { %p1752_p4 = pnand %p1751_p0, %p1747_p12 }
  0x58   : > { %1755 = shalt.err (!%p1752_p4)
}
  0x59   : > { %s2670_s22 = smov 8   ;;  %s2671_s12 = smov 128  }
  0x5a   : > { %s2672_s9 = sld [smem:[#allocation24_spill]]  ;;  %s1304_s2 = smul.u32 24, %s1897_s27 }
  0x5b   : > { %s1409_s30 = sshll.u32 %s192_s15, 1  ;;  %s191_s6 = scalar_lea.vmem [#allocation5], %s1408_s20 }
  0x5c   : > { %s1305_s14 = sadd.s32 %s1409_s30, %s1304_s2  ;;  %s203_s17 = sshll.u32 %s191_s6, 4  ;;  %s204_s17 = int_to_ptr.vmem [resolvable:$true] %s203_s17 }
  0x5d   : > { %s1410_s24 = sshll.u32 %s1305_s14, 3  ;;  %s2674_s11 = sand.u32 1, %s1893_s26  }
  0x5e   : > { %s1307_s19 = scalar_lea.hbm %s2623_s1, %s1410_s24 }
  0x5f   : > { %s1308_s7 = scalar_lea.hbm %s1307_s19, 128 }
  0x60   : > { %s2673_s29 = int_to_ptr.vmem [resolvable:$true] %s2672_s9  ;;  %s201_s4 = sshll.u32 %s1308_s7, 4  ;;  %s202_s4 = int_to_ptr.hbm [resolvable:$true] %s201_s4 }
  0x61   : > { %1454 = dma.hbm_to_vmem [thread:$0]  (!%p2049_p13), %s247_s21, 256, %s2673_s29, %s2058_s8, %s2671_s12, %s2671_s12, %s2670_s22  }
  0x62   : > { %s188_s9 = scalar_lea.sflag [#allocation6], %s2674_s11  ;;  %s1771_s5 = sshra.s32 %s202_s4, 4  ;;  %s1772_s5 = int_to_ptr.hbm [resolvable:$true] %s1771_s5 }
  0x63   : > { %s1773_s8 = scalar_lea.hbm %s1772_s5, 16  ;;  %p1775_p13 = pneg %p2105_p10 }
  0x64   : > { %p1774_p12 = scmp.ne.s32.totalorder %s1772_s5, %s1773_s8  ;;  %s1778_s21 = scalar_lea.hbm %s2623_s1, 384 }
  0x65   : > { %p1779_p9 = scmp.lt.s32.totalorder %s1772_s5, %s2623_s1  ;;  %p1780_p8 = scmp.lt.s32.totalorder %s1778_s21, %s1773_s8 }
  0x66   : > { %p1776_p3 = pnand %p1775_p13, %p1774_p12 }
  0x67   : > { %p1781_p1 = por %p1780_p8, %p1779_p9 }
  0x68   : > { %p1777_p5 = pneg %p1776_p3 }
  0x6a   : > { %p1782_p0 = pnand %p1781_p1, %p1777_p5 }
  0x6c   : > { %1785 = shalt.err (!%p1782_p0)
}
  0x6d   : > { %1448 = dma.hbm_to_vmem [thread:$0]  (!%p2105_p10), %s202_s4, 256, %s204_s17, %s188_s9, %s2671_s12, %s2671_s12, %s2670_s22  }
  0x6e   : > { %260 = sbr.rel (%p2079_p2) target bundleno = 983 (0x3d7), region = 32  ;;  %s262_s11 = sand.u32 (!%p2079_p2), 1, %s1889_s0  }
  0x6f   : > { %s1416_s7 = sshll.u32 (!%p2079_p2), %s262_s11, 4  ;;  %s263_s2 = scalar_lea.sflag (!%p2079_p2), [#allocation6], %s262_s11 }
  0x70   : > { %s266_s30 = scalar_lea.vmem (!%p2079_p2), [#allocation5], %s1416_s7 }
  0x73   : > { %1860 = dma.done.wait (%p2094_p7), %s263_s2, 256  }
  0x74   : > { %1862 = vsyncadd (%p2094_p7), %s263_s2, 4294967040  ;;  %s272_s5 = sand.u32 1, %s1995_s28   ;;  %s274_s4 = sand.u32 1, %s1877_s23  }
  0x75   : > { %s2172_s13 = sshll.u32 %s274_s4, 4  ;;  %s273_s16 = scalar_lea.sflag [#allocation9], %s272_s5 }
  0x76   : > { %s276_s22 = scalar_lea.vmem [#allocation8], %s2172_s13 }
  0x77   : > { %1864 = dma.done.wait (%p2024_p6), %s273_s16, 512  }
  0x78   : > { %1866 = vsyncadd (%p2024_p6), %s273_s16, 4294966784  ;;  %v330_v0 = vld [vmem:[%s266_s30] sm:$0xff]  ;;  %v331_v1 = vld [vmem:[%s266_s30 + $0x8] sm:$0xff]  ;;  %vm338_vm0 = vcmask 130048   ;;  %v1902_v2 = vmov 0.0   ;;  %p327_p6 = scmp.lt.s32.totalorder %s1995_s28, 1 }
  0x79   : > { %vm332_vm1 = vcmp.eq.f32.partialorder %v330_v0, 1.0  ;;  %vm333_vm2 = vcmp.eq.f32.partialorder %v331_v1, 1.0  ;;  %s2675_s17 = sld [smem:[#allocation29_spill]]  ;;  %vm355_vm3 = vcmask 0   ;;  %s286_s19 = scalar_lea.vmem [#allocation10], %s2172_s13 }
  0x7a   : > { %v1420_v3 = vsel %vm332_vm1, 1.0, %v1902_v2  ;;  %v1421_v4 = vsel %vm333_vm2, 1.0, %v1902_v2  ;;  %s328_s10 = scalar_select %p327_p6, %s1995_s28, 1 }
  0x7b   : > { %v339_v5 = vsel %vm338_vm0, %v1420_v3, 0.0  ;;  %v340_v6 = vsel %vm338_vm0, %v1421_v4, 0.0  ;;  %s2188_s9 = scalar_lea.vmem [#allocation11], %s2172_s13 }
  0x7c   : > { %v341_v7 = vadd.f32 %v340_v6, %v339_v5 }
  0x7e   : > { %342 = vadd.xlane.f32.xlu0 %v341_v7 }
  0x7f   : > { %s329_s24 = scalar_lea.vmem %s2675_s17, %s328_s10 }
  0xf1   : > { %v343_v8 = vpop.xlane.xlu0 %342 }
  0xf2   : > { %v344_v9 = vrot.slane %v343_v8, 4 }
  0xf4   : > { %v345_v10 = vadd.f32 %v344_v9, %v343_v8 }
  0xf6   : > { %v346_v11 = vrot.slane %v345_v10, 2 }
  0xf8   : > { %v347_v12 = vadd.f32 %v346_v11, %v345_v10 }
  0xfa   : > { %v348_v13 = vrot.slane %v347_v12, 1 }
  0xfc   : > { %v349_v14 = vadd.f32 %v348_v13, %v347_v12 }
  0xfe   : > { %1431 = vpush %v349_v14 }
 0x12f   : > { %s1432_s18 = spop %1431 }
 0x130   : > { %p351_p2 = scmp.gt.f32.partialorder %s1432_s18, 0.0 }
 0x131   : > { %360 = vst.msk [vmem:[%s2188_s9] sm:$0xff] (%p351_p2), %vm338_vm0, %v1420_v3 }
 0x132   : > { %s352_s12 = scalar_select %p351_p2, 1, 0  ;;  %361 = vst.msk [vmem:[%s2188_s9 + $0x8] sm:$0xff] (%p351_p2), %vm338_vm0, %v1421_v4 }
 0x133   : > { %359 = sbr.rel (!%p351_p2) target bundleno = 312 (0x138), region = 48 }
 0x134   : > { %s353_s25 = scvt.s32.f32 %s352_s12 }
 0x136   : > { %v354_v15 = vstv %s353_s25 }
 0x137   : > { %356 = vst.msk [vmem:[%s329_s24] sm:$0x1] %vm355_vm3, %v354_v15 }
 0x138 PF: > { %364 = sbr.rel (%p351_p2) target bundleno = 962 (0x3c2), region = 52  ;;  %s1904_s8 = smov (!%p351_p2), 10  }
 0x139   : > { %s1905_s29 = smov (!%p351_p2), 1   ;;  %s1906_s20 = smov (!%p351_p2), 126  }
 0x13a   : > { %s1907_s21 = smov (!%p351_p2), 127   ;;  %s1908_s3 = smov (!%p351_p2), 2  }
 0x13b   : > { %s1909_s15 = smov (!%p351_p2), 4   ;;  %s1910_s11 = smov (!%p351_p2), 3  }
 0x13c   : > { %s1911_s7 = smov (!%p351_p2), 125   ;;  %s1912_s2 = smov (!%p351_p2), 124  }
 0x13d   : > { %v365_v16 = vld [vmem:[%s276_s22] sm:$0xff]  ;;  %v366_v17 = vld [vmem:[%s276_s22 + $0x8] sm:$0xff]  ;;  %v1903_v18 = vmov 0.0   ;;  %s1913_s30 = smov 5   ;;  %s1914_s5 = smov 123   ;;  %v384_v22 = vlaneseq  ;;  %vm381_vm6 = vcmask 212048  }
 0x13e   : > { %vm367_vm4 = vcmp.ne.f32.partialorder %v365_v16, 0.0  ;;  %vm368_vm5 = vcmp.ne.f32.partialorder %v366_v17, 0.0  ;;  %1555 = vrot.lane.b32.xlu2 %v1903_v18, %s1905_s29  ;;  %1580 = vrot.lane.b32.xlu1 %v1903_v18, %s1906_s20  ;;  %s1915_s16 = smov 6   ;;  %s1916_s22 = smov 122  }
 0x13f   : > { %v1422_v19 = vsel %vm367_vm4, 1.0, %v1903_v18  ;;  %v1423_v20 = vsel %vm368_vm5, 1.0, %v1903_v18  ;;  %s1917_s10 = smov 7   ;;  %v392_v24 = vand.u32 127, %v384_v22  ;;  %s1918_s18 = smov 121  }
 0x140   : > { %v1544_v21 = vpack.i.bf16 %v1423_v20, %v1422_v19  ;;  %s1919_s12 = smov 8   ;;  %s1920_s14 = smov 120  }
 0x141   : > { %vm411_vm7 = vcmp.ge.s32.totalorder %v392_v24, 10  ;;  %vm418_vm8 = vcmp.lt.s32.totalorder %v392_v24, 26  ;;  %s1921_s6 = smov 9   ;;  %s1922_s17 = smov 119  }
 0x142   : > { %1545 = vrot.lane.b32.xlu0 %v1544_v21, %s1904_s8  ;;  %vm2244_vm9 = vmand %vm411_vm7, %vm418_vm8  ;;  %s1923_s24 = smov 118  }
 0x146   : > { %1560 = vrot.lane.b32.xlu2 %v1903_v18, %s1907_s21  ;;  %1585 = vrot.lane.b32.xlu1 %v1903_v18, %s1906_s20 }
 0x14a   : > { %1550 = vrot.lane.b32.xlu0 %v1903_v18, %s1905_s29 }
 0x14e   : > { %1565 = vrot.lane.b32.xlu2 %v1903_v18, %s1907_s21  ;;  %1610 = vrot.lane.b32.xlu1 %v1903_v18, %s1909_s15 }
 0x152   : > { %1570 = vrot.lane.b32.xlu0 %v1903_v18, %s1908_s3 }
 0x156   : > { %1590 = vrot.lane.b32.xlu2 %v1903_v18, %s1910_s11  ;;  %1615 = vrot.lane.b32.xlu1 %v1903_v18, %s1909_s15 }
 0x15a   : > { %1575 = vrot.lane.b32.xlu0 %v1903_v18, %s1908_s3 }
 0x15e   : > { %1595 = vrot.lane.b32.xlu2 %v1903_v18, %s1910_s11 }
 0x162   : > { %1600 = vrot.lane.b32.xlu0 %v1903_v18, %s1911_s7 }
 0x166   : > { %1620 = vrot.lane.b32.xlu2 %v1903_v18, %s1912_s2 }
 0x16a   : > { %1605 = vrot.lane.b32.xlu0 %v1903_v18, %s1911_s7 }
 0x16e   : > { %1625 = vrot.lane.b32.xlu2 %v1903_v18, %s1912_s2 }
 0x172   : > { %1630 = vrot.lane.b32.xlu0 %v1903_v18, %s1913_s30 }
 0x17a   : > { %1635 = vrot.lane.b32.xlu0 %v1903_v18, %s1914_s5 }
 0x182   : > { %1640 = vrot.lane.b32.xlu0 %v1903_v18, %s1915_s16 }
 0x18a   : > { %1645 = vrot.lane.b32.xlu0 %v1903_v18, %s1916_s22 }
 0x192   : > { %1650 = vrot.lane.b32.xlu0 %v1903_v18, %s1917_s10 }
 0x198   : > { %v1556_v33 = vpop.permute.xlu2 %1555 }
 0x199   : > { %v1558_v43 = vunpack.i.h.bf16 %v1556_v33  ;;  %v1557_v44 = vunpack.i.l.bf16 %v1556_v33 }
 0x1a0   : > { %v1561_v37 = vpop.permute.xlu2 %1560 }
 0x1a1   : > { %v1563_v38 = vunpack.i.h.bf16 %v1561_v37  ;;  %v1562_v39 = vunpack.i.l.bf16 %v1561_v37 }
 0x1a8   : > { %v1566_v45 = vpop.permute.xlu2 %1565 }
 0x1a9   : > { %v1568_v46 = vunpack.i.h.bf16 %v1566_v45  ;;  %v1567_v47 = vunpack.i.l.bf16 %v1566_v45  ;;  %v2293_v45 = vshrl.u32 %v384_v22, 7 }
 0x1ab   : > { %v497_v48 = vmax.f32 %v1557_v44, %v1567_v47  ;;  %v498_v49 = vmax.f32 %v1558_v43, %v1568_v46  ;;  %vm619_vm10 = vcmp.lt.s32.totalorder %v2293_v45, 1  ;;  %vm632_vm11 = vcmp.lt.s32.totalorder %v2293_v45, 7 }
 0x1ac   : > { %vm443_vm12 = vcmp.lt.s32.totalorder %v2293_v45, 2  ;;  %vm456_vm13 = vcmp.lt.s32.totalorder %v2293_v45, 6  ;;  %vm862_vm14 = vcmp.lt.s32.totalorder %v2293_v45, 3  ;;  %vm849_vm15 = vcmp.lt.s32.totalorder %v2293_v45, 5 }
 0x1ad   : > { %v503_v10 = vmax.f32 %v497_v48, 0.0  ;;  %v504_v11 = vmax.f32 %v498_v49, 0.0  ;;  %vm1067_vm1 = vcmp.lt.s32.totalorder %v2293_v45, 4  ;;  %v1226_v45 = vld [vmem:[%s286_s19] sm:$0xff] }
 0x1ae   : > { %vm1228_vm2 = vcmp.gt.f32.partialorder %v1226_v45, 0.0 }
 0x1b0   : > { %v1591_v57 = vpop.permute.xlu2 %1590  ;;  %v1581_v58 = vpop.permute.xlu1 %1580 }
 0x1b1   : > { %v1593_v59 = vunpack.i.h.bf16 %v1591_v57  ;;  %v1592_v60 = vunpack.i.l.bf16 %v1591_v57  ;;  %v1583_v61 = vunpack.i.h.bf16 %v1581_v58  ;;  %v1582_v62 = vunpack.i.l.bf16 %v1581_v58 }
 0x1b4   : > { %v1546_v23 = vpop.permute.xlu0 %1545 }
 0x1b5   : > { %v1548_v25 = vunpack.i.h.bf16 %v1546_v23  ;;  %v1547_v26 = vunpack.i.l.bf16 %v1546_v23 }
 0x1b7   : > { %383 = vst.msk [vmem:[#allocation2 + $0x18] sm:$0xff] %vm381_vm6, %v1548_v25 }
 0x1b8   : > { %382 = vst.msk [vmem:[#allocation2 + $0x10] sm:$0xff] %vm381_vm6, %v1547_v26  ;;  %v1596_v12 = vpop.permute.xlu2 %1595  ;;  %v1586_v13 = vpop.permute.xlu1 %1585 }
 0x1b9   : > { %v1598_v14 = vunpack.i.h.bf16 %v1596_v12  ;;  %v1597_v15 = vunpack.i.l.bf16 %v1596_v12  ;;  %v1588_v16 = vunpack.i.h.bf16 %v1586_v13  ;;  %v1587_v17 = vunpack.i.l.bf16 %v1586_v13 }
 0x1bc   : > { %v1551_v28 = vpop.permute.xlu0 %1550 }
 0x1bd   : > { %v1553_v35 = vunpack.i.h.bf16 %v1551_v28  ;;  %v1552_v36 = vunpack.i.l.bf16 %v1551_v28 }
 0x1be   : > { %v428_v29 = vld [vmem:[#allocation2 + $0x18] sm:$0xff] }
 0x1bf   : > { %v2250_v30 = vsel %vm2244_vm9, %v428_v29, 0.0  ;;  %v427_v31 = vld [vmem:[#allocation2 + $0x10] sm:$0xff]  ;;  %v493_v40 = vmax.f32 %v1552_v36, %v1562_v39  ;;  %v494_v41 = vmax.f32 %v1553_v35, %v1563_v38 }
 0x1c0   : > { %v2254_v32 = vsel %vm2244_vm9, %v427_v31, 0.0  ;;  %511 = vrot.lane.b32.xlu2 %v2250_v30, %s1908_s3  ;;  %v1621_v28 = vpop.permute.xlu2 %1620  ;;  %v1611_v29 = vpop.permute.xlu1 %1610 }
 0x1c1   : > { %485 = vrot.lane.b32.xlu0 %v2254_v32, %s1907_s21  ;;  %473 = vrot.lane.b32.xlu1 %v2254_v32, %s1905_s29  ;;  %v499_v55 = vmax.f32 %v493_v40, 0.0  ;;  %v500_v56 = vmax.f32 %v494_v41, 0.0  ;;  %v1622_v35 = vunpack.i.l.bf16 %v1621_v28  ;;  %v1613_v36 = vunpack.i.h.bf16 %v1611_v29 }
 0x1c2   : > { %v1612_v37 = vunpack.i.l.bf16 %v1611_v29 }
 0x1c4   : > { %v1571_v34 = vpop.permute.xlu0 %1570  ;;  %v601_v41 = vmax.f32 %v1612_v37, %v1622_v35 }
 0x1c5   : > { %v1573_v51 = vunpack.i.h.bf16 %v1571_v34  ;;  %v1572_v52 = vunpack.i.l.bf16 %v1571_v34  ;;  %v1623_v34 = vunpack.i.h.bf16 %v1621_v28 }
 0x1c7   : > { %v529_v2 = vmax.f32 %v1572_v52, %v1582_v62  ;;  %v530_v3 = vmax.f32 %v1573_v51, %v1583_v61 }
 0x1c8   : > { %521 = vrot.lane.b32.xlu2 %v2254_v32, %s1906_s20  ;;  %v1616_v22 = vpop.permute.xlu1 %1615  ;;  %v1626_v57 = vpop.permute.xlu2 %1625 }
 0x1c9   : > { %523 = vrot.lane.b32.xlu0 %v2250_v30, %s1906_s20  ;;  %475 = vrot.lane.b32.xlu1 %v2250_v30, %s1905_s29  ;;  %v535_v4 = vmax.f32 %v499_v55, %v529_v2  ;;  %v536_v5 = vmax.f32 %v500_v56, %v530_v3  ;;  %v1618_v55 = vunpack.i.h.bf16 %v1616_v22  ;;  %v1617_v56 = vunpack.i.l.bf16 %v1616_v22 }
 0x1ca   : > { %v1628_v58 = vunpack.i.h.bf16 %v1626_v57 }
 0x1cc   : > { %v1576_v42 = vpop.permute.xlu0 %1575  ;;  %v606_v62 = vmax.f32 %v1618_v55, %v1628_v58 }
 0x1cd   : > { %v1578_v6 = vunpack.i.h.bf16 %v1576_v42  ;;  %v1577_v7 = vunpack.i.l.bf16 %v1576_v42  ;;  %v602_v42 = vmax.f32 %v1613_v36, %v1623_v34 }
 0x1cf   : > { %v533_v23 = vmax.f32 %v1577_v7, %v1587_v17  ;;  %v534_v24 = vmax.f32 %v1578_v6, %v1588_v16 }
 0x1d0   : > { %559 = vrot.lane.b32.xlu2 %v2250_v30, %s1911_s7 }
 0x1d1   : > { %545 = vrot.lane.b32.xlu0 %v2254_v32, %s1910_s11  ;;  %487 = vrot.lane.b32.xlu1 %v2250_v30, %s1907_s21  ;;  %v539_v25 = vmax.f32 %v503_v10, %v533_v23  ;;  %v540_v26 = vmax.f32 %v504_v11, %v534_v24 }
 0x1d4   : > { %v1601_v50 = vpop.permute.xlu0 %1600 }
 0x1d5   : > { %v1603_v53 = vunpack.i.h.bf16 %v1601_v50  ;;  %v1602_v54 = vunpack.i.l.bf16 %v1601_v50 }
 0x1d7   : > { %v565_v63 = vmax.f32 %v1592_v60, %v1602_v54  ;;  %v566_v0 = vmax.f32 %v1593_v59, %v1603_v53  ;;  %v1627_v59 = vunpack.i.l.bf16 %v1626_v57 }
 0x1d8   : > { %581 = vrot.lane.b32.xlu2 %v2254_v32, %s1909_s15 }
 0x1d9   : > { %583 = vrot.lane.b32.xlu0 %v2250_v30, %s1909_s15  ;;  %509 = vrot.lane.b32.xlu1 %v2254_v32, %s1908_s3  ;;  %v571_v31 = vmax.f32 %v535_v4, %v565_v63  ;;  %v572_v33 = vmax.f32 %v536_v5, %v566_v0  ;;  %v605_v61 = vmax.f32 %v1617_v56, %v1627_v59 }
 0x1db   : > { %v607_v46 = vmax.f32 %v571_v31, %v601_v41  ;;  %v2295_v47 = vmax.f32 %v572_v33, %v602_v42 }
 0x1dc   : > { %v1606_v1 = vpop.permute.xlu0 %1605 }
 0x1dd   : > { %v1608_v8 = vunpack.i.h.bf16 %v1606_v1  ;;  %v1607_v9 = vunpack.i.l.bf16 %v1606_v1  ;;  %v613_v50 = vrot.slane %v607_v46, 7  ;;  %v614_v51 = vrot.slane %v2295_v47, 7 }
 0x1df   : > { %v569_v19 = vmax.f32 %v1597_v15, %v1607_v9  ;;  %v570_v20 = vmax.f32 %v1598_v14, %v1608_v8  ;;  %v2309_v54 = vsel %vm619_vm10, %v613_v50, %v614_v51 }
 0x1e0   : > { %657 = vrot.lane.b32.xlu2 %v2250_v30, %s1913_s30 }
 0x1e1   : > { %593 = vrot.lane.b32.xlu0 %v2254_v32, %s1912_s2  ;;  %547 = vrot.lane.b32.xlu1 %v2250_v30, %s1910_s11  ;;  %v575_v52 = vmax.f32 %v539_v25, %v569_v19  ;;  %v576_v53 = vmax.f32 %v540_v26, %v570_v20 }
 0x1e3   : > { %v2313_v63 = vmax.f32 %v575_v52, %v605_v61  ;;  %v612_v0 = vmax.f32 %v576_v53, %v606_v62  ;;  %v439_v61 = vrot.slane %v2254_v32, 6 }
 0x1e4   : > { %v1631_v21 = vpop.permute.xlu0 %1630 }
 0x1e5   : > { %v1633_v38 = vunpack.i.h.bf16 %v1631_v21  ;;  %v1632_v39 = vunpack.i.l.bf16 %v1631_v21  ;;  %v630_v2 = vrot.slane %v2313_v63, 1  ;;  %v631_v3 = vrot.slane %v612_v0, 1 }
 0x1e7   : > { %v2327_v7 = vsel %vm632_vm11, %v630_v2, %v631_v3 }
 0x1e8   : > { %669 = vrot.lane.b32.xlu2 %v2250_v30, %s1914_s5 }
 0x1e9   : > { %1655 = vrot.lane.b32.xlu0 %v1903_v18, %s1918_s18  ;;  %557 = vrot.lane.b32.xlu1 %v2254_v32, %s1911_s7 }
 0x1ec   : > { %v1636_v40 = vpop.permute.xlu0 %1635 }
 0x1ed   : > { %v1638_v43 = vunpack.i.h.bf16 %v1636_v40  ;;  %v1637_v44 = vunpack.i.l.bf16 %v1636_v40 }
 0x1ef   : > { %v676_v48 = vmax.f32 %v1632_v39, %v1637_v44  ;;  %v679_v49 = vmax.f32 %v1633_v38, %v1638_v43 }
 0x1f0   : > { %693 = vrot.lane.b32.xlu2 %v2250_v30, %s1915_s16 }
 0x1f1   : > { %1660 = vrot.lane.b32.xlu0 %v1903_v18, %s1919_s12  ;;  %595 = vrot.lane.b32.xlu1 %v2250_v30, %s1912_s2  ;;  %v682_v1 = vmax.f32 %v2295_v47, %v676_v48  ;;  %v685_v4 = vmax.f32 %v2313_v63, %v679_v49 }
 0x1f4   : > { %v1641_v60 = vpop.permute.xlu0 %1640 }
 0x1f5   : > { %v1643_v5 = vunpack.i.h.bf16 %v1641_v60  ;;  %v1642_v6 = vunpack.i.l.bf16 %v1641_v60  ;;  %v437_v60 = vrot.slane %v1903_v18, 6 }
 0x1f8   : > { %705 = vrot.lane.b32.xlu2 %v2250_v30, %s1916_s22 }
 0x1f9   : > { %1665 = vrot.lane.b32.xlu0 %v1903_v18, %s1920_s14  ;;  %655 = vrot.lane.b32.xlu1 %v2254_v32, %s1913_s30 }
 0x1fc   : > { %v1646_v8 = vpop.permute.xlu0 %1645 }
 0x1fd   : > { %v1648_v9 = vunpack.i.h.bf16 %v1646_v8  ;;  %v1647_v10 = vunpack.i.l.bf16 %v1646_v8  ;;  %v454_v8 = vrot.slane %v1903_v18, 2 }
 0x1ff   : > { %v712_v11 = vmax.f32 %v1642_v6, %v1647_v10  ;;  %v715_v12 = vmax.f32 %v1643_v5, %v1648_v9 }
 0x200   : > { %741 = vrot.lane.b32.xlu2 %v2250_v30, %s1917_s10 }
 0x201   : > { %1670 = vrot.lane.b32.xlu0 %v1903_v18, %s1921_s6  ;;  %667 = vrot.lane.b32.xlu1 %v2254_v32, %s1914_s5  ;;  %v2334_v13 = vmax.f32 %v682_v1, %v712_v11  ;;  %v2336_v14 = vmax.f32 %v685_v4, %v715_v12  ;;  %v447_v11 = vsel %vm443_vm12, %v437_v60, %v439_v61 }
 0x204   : > { %v1651_v17 = vpop.permute.xlu0 %1650 }
 0x205   : > { %v1653_v22 = vunpack.i.h.bf16 %v1651_v17  ;;  %v1652_v52 = vunpack.i.l.bf16 %v1651_v17 }
 0x208   : > { %753 = vrot.lane.b32.xlu2 %v2250_v30, %s1918_s18 }
 0x209   : > { %1675 = vrot.lane.b32.xlu0 %v1903_v18, %s1922_s17  ;;  %691 = vrot.lane.b32.xlu1 %v2254_v32, %s1915_s16 }
 0x210   : > { %813 = vrot.lane.b32.xlu2 %v2250_v30, %s1919_s12 }
 0x211   : > { %1090 = vrot.lane.b32.xlu0 %v2254_v32, %s1904_s8  ;;  %703 = vrot.lane.b32.xlu1 %v2254_v32, %s1916_s22 }
 0x218   : > { %825 = vrot.lane.b32.xlu2 %v2250_v30, %s1920_s14 }
 0x219   : > { %1104 = vrot.lane.b32.xlu0 %v2250_v30, %s1923_s24  ;;  %739 = vrot.lane.b32.xlu1 %v2254_v32, %s1917_s10 }
 0x21a   : > { %v512_v15 = vpop.permute.xlu2 %511 }
 0x220   : > { %923 = vrot.lane.b32.xlu2 %v2250_v30, %s1921_s6 }
 0x221   : > { %751 = vrot.lane.b32.xlu1 %v2254_v32, %s1918_s18 }
 0x222   : > { %v522_v16 = vpop.permute.xlu2 %521 }
 0x228   : > { %935 = vrot.lane.b32.xlu2 %v2250_v30, %s1922_s17 }
 0x229   : > { %811 = vrot.lane.b32.xlu1 %v2254_v32, %s1919_s12 }
 0x22a   : > { %v560_v19 = vpop.permute.xlu2 %559 }
 0x230   : > { %1102 = vrot.lane.b32.xlu2 %v2254_v32, %s1923_s24 }
 0x231   : > { %823 = vrot.lane.b32.xlu1 %v2254_v32, %s1920_s14 }
 0x232   : > { %v582_v20 = vpop.permute.xlu2 %581 }
 0x233   : > { %v486_v21 = vpop.permute.xlu0 %485  ;;  %v474_v23 = vpop.permute.xlu1 %473 }
 0x234   : > { %v495_v36 = vmax.f32 %v474_v23, %v486_v21 }
 0x236   : > { %v501_v41 = vmax.f32 %v2254_v32, %v495_v36 }
 0x239   : > { %921 = vrot.lane.b32.xlu1 %v2254_v32, %s1921_s6 }
 0x23a   : > { %v658_v24 = vpop.permute.xlu2 %657 }
 0x23b   : > { %v524_v25 = vpop.permute.xlu0 %523  ;;  %v476_v26 = vpop.permute.xlu1 %475 }
 0x23c   : > { %v532_v34 = vmax.f32 %v512_v15, %v524_v25  ;;  %v453_v15 = vrot.slane %v2250_v30, 2 }
 0x241   : > { %933 = vrot.lane.b32.xlu1 %v2254_v32, %s1922_s17 }
 0x242   : > { %v670_v28 = vpop.permute.xlu2 %669 }
 0x243   : > { %v546_v29 = vpop.permute.xlu0 %545  ;;  %v488_v31 = vpop.permute.xlu1 %487  ;;  %v678_v21 = vmax.f32 %v658_v24, %v670_v28 }
 0x244   : > { %v496_v33 = vmax.f32 %v476_v26, %v488_v31 }
 0x246   : > { %v502_v35 = vmax.f32 %v2250_v30, %v496_v33 }
 0x248   : > { %v538_v37 = vmax.f32 %v502_v35, %v532_v34 }
 0x249   : > { %1092 = vrot.lane.b32.xlu1 %v2250_v30, %s1904_s8 }
 0x24a   : > { %v694_v38 = vpop.permute.xlu2 %693 }
 0x24b   : > { %v584_v39 = vpop.permute.xlu0 %583  ;;  %v510_v40 = vpop.permute.xlu1 %509 }
 0x24c   : > { %v531_v42 = vmax.f32 %v510_v40, %v522_v16 }
 0x24e   : > { %v537_v43 = vmax.f32 %v501_v41, %v531_v42 }
 0x252   : > { %v706_v44 = vpop.permute.xlu2 %705 }
 0x253   : > { %v594_v46 = vpop.permute.xlu0 %593  ;;  %v548_v48 = vpop.permute.xlu1 %547  ;;  %v714_v26 = vmax.f32 %v694_v38, %v706_v44 }
 0x254   : > { %v568_v49 = vmax.f32 %v548_v48, %v560_v19  ;;  %v603_v62 = vmax.f32 %v582_v20, %v594_v46  ;;  %v466_v20 = vmax.f32 %v447_v11, %v454_v8 }
 0x256   : > { %v574_v50 = vmax.f32 %v538_v37, %v568_v49 }
 0x25a   : > { %v742_v53 = vpop.permute.xlu2 %741 }
 0x25b   : > { %v1656_v55 = vpop.permute.xlu0 %1655  ;;  %v558_v56 = vpop.permute.xlu1 %557 }
 0x25c   : > { %v1658_v57 = vunpack.i.h.bf16 %v1656_v55  ;;  %v1657_v58 = vunpack.i.l.bf16 %v1656_v55  ;;  %v567_v59 = vmax.f32 %v546_v29, %v558_v56  ;;  %v458_v29 = vsel %vm456_vm13, %v453_v15, %v454_v8 }
 0x25d   : > { %v465_v35 = vmax.f32 %v437_v60, %v458_v29 }
 0x25e   : > { %v763_v0 = vmax.f32 %v1653_v22, %v1658_v57  ;;  %v760_v1 = vmax.f32 %v1652_v52, %v1657_v58  ;;  %v573_v3 = vmax.f32 %v537_v43, %v567_v59 }
 0x260   : > { %v769_v4 = vmax.f32 %v2336_v14, %v763_v0  ;;  %v2376_v5 = vmax.f32 %v2334_v13, %v760_v1  ;;  %v609_v6 = vmax.f32 %v573_v3, %v603_v62 }
 0x262   : > { %v754_v9 = vpop.permute.xlu2 %753  ;;  %v615_v10 = vrot.slane %v609_v6, 7  ;;  %v787_v40 = vrot.slane %v769_v4, 7 }
 0x263   : > { %v2381_v32 = vpop.permute.xlu0 %1660  ;;  %v596_v12 = vpop.permute.xlu1 %595  ;;  %v762_v33 = vmax.f32 %v742_v53, %v754_v9 }
 0x264   : > { %v604_v16 = vmax.f32 %v584_v39, %v596_v12  ;;  %v623_v17 = vsel %vm619_vm10, %v614_v51, %v615_v10 }
 0x265   : > { %v642_v19 = vmax.f32 %v623_v17, %v2327_v7  ;;  %v1663_v7 = vunpack.i.h.bf16 %v2381_v32 }
 0x266   : > { %v610_v23 = vmax.f32 %v574_v50, %v604_v16 }
 0x267   : > { %v648_v25 = vmax.f32 %v466_v20, %v642_v19 }
 0x268   : > { %v629_v31 = vrot.slane %v610_v23, 1  ;;  %v684_v30 = vmax.f32 %v610_v23, %v678_v21 }
 0x26a   : > { %v634_v47 = vsel %vm632_vm11, %v629_v31, %v630_v2  ;;  %v720_v51 = vmax.f32 %v684_v30, %v714_v26  ;;  %v814_v34 = vpop.permute.xlu2 %813 }
 0x26b   : > { %v641_v24 = vmax.f32 %v2309_v54, %v634_v47  ;;  %v2398_v28 = vpop.permute.xlu0 %1665  ;;  %v656_v36 = vpop.permute.xlu1 %655 }
 0x26c   : > { %v725_v37 = vmax.f32 %v2334_v13, %v720_v51  ;;  %v1668_v38 = vunpack.i.h.bf16 %v2398_v28  ;;  %v2402_v39 = vmax.f32 %v720_v51, %v762_v33 }
 0x26d   : > { %v647_v63 = vmax.f32 %v465_v35, %v641_v24 }
 0x26e   : > { %v786_v2 = vrot.slane %v2402_v39, 7  ;;  %v835_v42 = vmax.f32 %v1663_v7, %v1668_v38  ;;  %v772_v7 = vrot.slane %v2376_v5, 1  ;;  %v774_v35 = vrot.slane %v2402_v39, 1 }
 0x26f   : > { %v2405_v41 = vmax.f32 %v647_v63, %v725_v37 }
 0x270   : > { %v2409_v43 = vsel %vm619_vm10, %v786_v2, %v787_v40  ;;  %v841_v44 = vmax.f32 %v769_v4, %v835_v42  ;;  %v1662_v40 = vunpack.i.l.bf16 %v2381_v32  ;;  %v1667_v42 = vunpack.i.l.bf16 %v2398_v28 }
 0x272   : > { %v826_v54 = vpop.permute.xlu2 %825  ;;  %v860_v50 = vrot.slane %v841_v44, 5  ;;  %v897_v22 = vrot.slane %v841_v44, 6 }
 0x273   : > { %v834_v46 = vmax.f32 %v814_v34, %v826_v54  ;;  %v2411_v48 = vpop.permute.xlu0 %1670  ;;  %v668_v13 = vpop.permute.xlu1 %667 }
 0x274   : > { %v1673_v58 = vunpack.i.h.bf16 %v2411_v48  ;;  %v677_v0 = vmax.f32 %v656_v36, %v668_v13 }
 0x275   : > { %v2414_v49 = vmax.f32 %v2402_v39, %v834_v46 }
 0x276   : > { %v683_v8 = vmax.f32 %v609_v6, %v677_v0 }
 0x277   : > { %v859_v52 = vrot.slane %v2414_v49, 5  ;;  %v896_v53 = vrot.slane %v2414_v49, 6 }
 0x279   : > { %v2423_v55 = vsel %vm862_vm14, %v859_v52, %v860_v50  ;;  %v2429_v56 = vsel %vm443_vm12, %v896_v53, %v897_v22  ;;  %v832_v50 = vmax.f32 %v1662_v40, %v1667_v42 }
 0x27a   : > { %v924_v57 = vpop.permute.xlu2 %923 }
 0x27b   : > { %v2432_v59 = vpop.permute.xlu0 %1675  ;;  %v692_v60 = vpop.permute.xlu1 %691  ;;  %v838_v22 = vmax.f32 %v2376_v5, %v832_v50 }
 0x27c   : > { %v1678_v61 = vunpack.i.h.bf16 %v2432_v59 }
 0x27e   : > { %v945_v62 = vmax.f32 %v1673_v58, %v1678_v61  ;;  %v844_v61 = vrot.slane %v838_v22, 3 }
 0x280   : > { %v951_v3 = vmax.f32 %v841_v44, %v945_v62  ;;  %v882_v62 = vrot.slane %v838_v22, 2 }
 0x282   : > { %v936_v1 = vpop.permute.xlu2 %935  ;;  %v969_v15 = vrot.slane %v951_v3, 1  ;;  %v1005_v16 = vrot.slane %v951_v3, 2  ;;  %v1041_v17 = vrot.slane %v951_v3, 3  ;;  %v1065_v21 = vrot.slane %v951_v3, 4 }
 0x283   : > { %v704_v4 = vpop.permute.xlu1 %703  ;;  %v944_v9 = vmax.f32 %v924_v57, %v936_v1  ;;  %v1672_v3 = vunpack.i.l.bf16 %v2411_v48 }
 0x284   : > { %v713_v10 = vmax.f32 %v692_v60, %v704_v4 }
 0x285   : > { %v2436_v11 = vmax.f32 %v2414_v49, %v944_v9 }
 0x286   : > { %v719_v12 = vmax.f32 %v683_v8, %v713_v10 }
 0x287   : > { %v968_v20 = vrot.slane %v2436_v11, 1  ;;  %v1004_v6 = vrot.slane %v2436_v11, 2  ;;  %v1040_v23 = vrot.slane %v2436_v11, 3  ;;  %v1064_v26 = vrot.slane %v2436_v11, 4 }
 0x288   : > { %v726_v19 = vmax.f32 %v719_v12, %v2336_v14 }
 0x289   : > { %v2449_v31 = vsel %vm632_vm11, %v968_v20, %v969_v15  ;;  %v2455_v14 = vsel %vm456_vm13, %v1004_v6, %v1005_v16  ;;  %v2461_v33 = vsel %vm849_vm15, %v1040_v23, %v1041_v17 }
 0x28a   : > { %v732_v29 = vmax.f32 %v648_v25, %v726_v19  ;;  %v2467_v25 = vsel %vm1067_vm1, %v1064_v26, %v1065_v21 }
 0x28b   : > { %v740_v30 = vpop.permute.xlu1 %739 }
 0x293   : > { %v752_v47 = vpop.permute.xlu1 %751 }
 0x294   : > { %v761_v51 = vmax.f32 %v740_v30, %v752_v47 }
 0x296   : > { %v767_v34 = vmax.f32 %v719_v12, %v761_v51 }
 0x298   : > { %v773_v24 = vrot.slane %v767_v34, 1  ;;  %v785_v36 = vrot.slane %v767_v34, 7 }
 0x29a   : > { %v779_v37 = vsel %vm632_vm11, %v773_v24, %v774_v35  ;;  %v780_v38 = vsel %vm632_vm11, %v772_v7, %v773_v24  ;;  %v791_v63 = vsel %vm619_vm10, %v785_v36, %v786_v2  ;;  %v846_v2 = vrot.slane %v2414_v49, 3 }
 0x29b   : > { %v797_v54 = vmax.f32 %v780_v38, %v791_v63  ;;  %v798_v44 = vmax.f32 %v779_v37, %v2409_v43  ;;  %v812_v46 = vpop.permute.xlu1 %811  ;;  %v884_v43 = vrot.slane %v2414_v49, 2  ;;  %v1091_v49 = vpop.permute.xlu0 %1090  ;;  %v956_v36 = vrot.slane %v2436_v11, 7 }
 0x29c   : > { %v992_v37 = vrot.slane %v2436_v11, 6 }
 0x29d   : > { %v803_v39 = vmax.f32 %v2405_v41, %v797_v54  ;;  %v804_v13 = vmax.f32 %v732_v29, %v798_v44  ;;  %v1677_v41 = vunpack.i.l.bf16 %v2432_v59  ;;  %v1028_v54 = vrot.slane %v2436_v11, 5 }
 0x29f   : > { %v942_v19 = vmax.f32 %v1672_v3, %v1677_v41 }
 0x2a1   : > { %v948_v47 = vmax.f32 %v838_v22, %v942_v19 }
 0x2a3   : > { %v824_v57 = vpop.permute.xlu1 %823  ;;  %v954_v7 = vrot.slane %v948_v47, 7  ;;  %v990_v35 = vrot.slane %v948_v47, 6  ;;  %v1026_v24 = vrot.slane %v948_v47, 5 }
 0x2a4   : > { %v833_v58 = vmax.f32 %v812_v46, %v824_v57 }
 0x2a6   : > { %v839_v60 = vmax.f32 %v767_v34, %v833_v58 }
 0x2a8   : > { %v845_v32 = vrot.slane %v839_v60, 3  ;;  %v858_v0 = vrot.slane %v839_v60, 5  ;;  %v883_v28 = vrot.slane %v839_v60, 2  ;;  %v895_v1 = vrot.slane %v839_v60, 6 }
 0x2aa   : > { %v890_v5 = vsel %vm456_vm13, %v882_v62, %v883_v28  ;;  %v901_v4 = vsel %vm443_vm12, %v895_v1, %v896_v53  ;;  %v852_v8 = vsel %vm849_vm15, %v845_v32, %v846_v2  ;;  %v853_v9 = vsel %vm849_vm15, %v844_v61, %v845_v32  ;;  %v1103_v1 = vpop.permute.xlu2 %1102 }
 0x2ab   : > { %v907_v10 = vmax.f32 %v890_v5, %v901_v4  ;;  %v922_v12 = vpop.permute.xlu1 %921  ;;  %v865_v48 = vsel %vm862_vm14, %v858_v0, %v859_v52  ;;  %v872_v59 = vmax.f32 %v852_v8, %v2423_v55  ;;  %v889_v15 = vsel %vm456_vm13, %v883_v28, %v884_v43  ;;  %v1105_v4 = vpop.permute.xlu0 %1104 }
 0x2ac   : > { %v871_v16 = vmax.f32 %v853_v9, %v865_v48  ;;  %v908_v53 = vmax.f32 %v889_v15, %v2429_v56  ;;  %v1062_v55 = vrot.slane %v948_v47, 4 }
 0x2ad   : > { %v878_v17 = vmax.f32 %v804_v13, %v872_v59 }
 0x2ae   : > { %v877_v21 = vmax.f32 %v803_v39, %v871_v16 }
 0x2af   : > { %v914_v29 = vmax.f32 %v878_v17, %v908_v53 }
 0x2b0   : > { %v913_v30 = vmax.f32 %v877_v21, %v907_v10 }
 0x2b3   : > { %v934_v51 = vpop.permute.xlu1 %933 }
 0x2b4   : > { %v943_v34 = vmax.f32 %v922_v12, %v934_v51 }
 0x2b6   : > { %v949_v52 = vmax.f32 %v839_v60, %v943_v34 }
 0x2b8   : > { %v955_v38 = vrot.slane %v949_v52, 7  ;;  %v967_v56 = vrot.slane %v949_v52, 1  ;;  %v991_v63 = vrot.slane %v949_v52, 6  ;;  %v1003_v40 = vrot.slane %v949_v52, 2 }
 0x2b9   : > { %v1027_v42 = vrot.slane %v949_v52, 5  ;;  %v1039_v44 = vrot.slane %v949_v52, 3  ;;  %v1063_v46 = vrot.slane %v949_v52, 4 }
 0x2ba   : > { %v961_v39 = vsel %vm619_vm10, %v955_v38, %v956_v36  ;;  %v962_v13 = vsel %vm619_vm10, %v954_v7, %v955_v38  ;;  %v973_v50 = vsel %vm632_vm11, %v967_v56, %v968_v20  ;;  %v997_v22 = vsel %vm443_vm12, %v991_v63, %v992_v37 }
 0x2bb   : > { %v979_v57 = vmax.f32 %v962_v13, %v973_v50  ;;  %v980_v58 = vmax.f32 %v961_v39, %v2449_v31  ;;  %v998_v60 = vsel %vm443_vm12, %v990_v35, %v991_v63  ;;  %v1009_v61 = vsel %vm456_vm13, %v1003_v40, %v1004_v6 }
 0x2bc   : > { %v1015_v62 = vmax.f32 %v998_v60, %v1009_v61  ;;  %v1016_v2 = vmax.f32 %v997_v22, %v2455_v14  ;;  %v1033_v20 = vsel %vm862_vm14, %v1027_v42, %v1028_v54  ;;  %v1034_v32 = vsel %vm862_vm14, %v1026_v24, %v1027_v42  ;;  %v1093_v14 = vpop.permute.xlu1 %1092  ;;  %v1227_v61 = vld [vmem:[%s286_s19 + $0x8] sm:$0xff] }
 0x2bd   : > { %v985_v0 = vmax.f32 %v913_v30, %v979_v57  ;;  %v1045_v31 = vsel %vm849_vm15, %v1039_v44, %v1040_v23  ;;  %v1052_v28 = vmax.f32 %v1033_v20, %v2461_v33  ;;  %v1070_v6 = vsel %vm1067_vm1, %v1063_v46, %v1064_v26 }
 0x2be   : > { %v1051_v43 = vmax.f32 %v1034_v32, %v1045_v31  ;;  %v1071_v3 = vsel %vm1067_vm1, %v1062_v55, %v1063_v46  ;;  %v1077_v41 = vmax.f32 %v1070_v6, %v2467_v25  ;;  %v986_v5 = vmax.f32 %v914_v29, %v980_v58 }
 0x2bf   : > { %v1021_v8 = vmax.f32 %v985_v0, %v1015_v62  ;;  %v1076_v9 = vmax.f32 %v1071_v3, %v1070_v6  ;;  %v1113_v10 = vmax.f32 %v1093_v14, %v1105_v4  ;;  %v1112_v33 = vmax.f32 %v1091_v49, %v1103_v1 }
 0x2c0   : > { %v1022_v23 = vmax.f32 %v986_v5, %v1016_v2  ;;  %v1182_v36 = vrot.slane %v1903_v18, 1  ;;  %vm1229_vm3 = vcmp.gt.f32.partialorder %v1227_v61, 0.0 }
 0x2c1   : > { %v1057_v12 = vmax.f32 %v1021_v8, %v1051_v43  ;;  %v1118_v15 = vmax.f32 %v949_v52, %v1112_v33  ;;  %v1119_v16 = vmax.f32 %v2436_v11, %v1113_v10  ;;  %v1170_v11 = vrot.slane %v1903_v18, 7 }
 0x2c2   : > { %v1058_v48 = vmax.f32 %v1022_v23, %v1052_v28 }
 0x2c3   : > { %v1082_v59 = vmax.f32 %v1057_v12, %v1076_v9 }
 0x2c4   : > { %v1083_v26 = vmax.f32 %v1058_v48, %v1077_v41 }
 0x2c5   : > { %v1124_v53 = vmax.f32 %v1082_v59, %v1118_v15 }
 0x2c6   : > { %v1125_v17 = vmax.f32 %v1083_v26, %v1119_v16 }
 0x2c7   : > { %v1130_v19 = vsub.f32 1.0, %v1124_v53 }
 0x2c8   : > { %v1131_v21 = vsub.f32 1.0, %v1125_v17 }
 0x2c9   : > { %v1136_v25 = vsel %vm2244_vm9, %v1130_v19, 0.0 }
 0x2ca   : > { %v1137_v29 = vsel %vm2244_vm9, %v1131_v21, 0.0  ;;  %1156 = vrot.lane.b32.xlu0 %v1136_v25, %s1907_s21  ;;  %1144 = vrot.lane.b32.xlu1 %v1136_v25, %s1905_s29  ;;  %v1172_v30 = vrot.slane %v1136_v25, 7  ;;  %v1184_v47 = vrot.slane %v1136_v25, 1 }
 0x2cb   : > { %1146 = vrot.lane.b32.xlu2 %v1137_v29, %s1905_s29  ;;  %v1185_v51 = vrot.slane %v1137_v29, 1  ;;  %v1173_v37 = vrot.slane %v1137_v29, 7 }
 0x2cc   : > { %v1179_v49 = vsel %vm619_vm10, %v1170_v11, %v1172_v30 }
 0x2cd   : > { %v1190_v7 = vsel %vm632_vm11, %v1184_v47, %v1185_v51  ;;  %v1178_v40 = vsel %vm619_vm10, %v1172_v30, %v1173_v37  ;;  %v1189_v42 = vsel %vm632_vm11, %v1185_v51, %v1182_v36 }
 0x2ce   : > { %v1196_v55 = vmax.f32 %v1179_v49, %v1190_v7  ;;  %v1197_v13 = vmax.f32 %v1178_v40, %v1189_v42 }
 0x2d2   : > { %1685 = vrot.lane.b32.xlu0 %v1903_v18, %s1905_s29  ;;  %1158 = vrot.lane.b32.xlu1 %v1137_v29, %s1907_s21 }
 0x2d3   : > { %1680 = vrot.lane.b32.xlu2 %v1903_v18, %s1905_s29 }
 0x2da   : > { %1690 = vrot.lane.b32.xlu1 %v1903_v18, %s1907_s21 }
 0x2db   : > { %1695 = vrot.lane.b32.xlu2 %v1903_v18, %s1907_s21 }
 0x325   : > { %v1147_v27 = vpop.permute.xlu2 %1146 }
 0x32d   : > { %v1681_v34 = vpop.permute.xlu2 %1680 }
 0x335   : > { %v1696_v56 = vpop.permute.xlu2 %1695 }
 0x33c   : > { %v1157_v35 = vpop.permute.xlu0 %1156  ;;  %v1145_v52 = vpop.permute.xlu1 %1144 }
 0x33d   : > { %v1166_v24 = vmax.f32 %v1145_v52, %v1157_v35 }
 0x33f   : > { %v1202_v38 = vmax.f32 %v1166_v24, %v1196_v55 }
 0x341   : > { %v1208_v63 = vmax.f32 %v1202_v38, %v1136_v25 }
 0x343   : > { %v1214_v54 = vsub.f32 %v1208_v63, %v1136_v25 }
 0x344   : > { %v1686_v44 = vpop.permute.xlu0 %1685  ;;  %v1159_v46 = vpop.permute.xlu1 %1158 }
 0x345   : > { %1220 = vst [vmem:[#allocation2 + $0x10] sm:$0xff] %v1214_v54  ;;  %v1167_v39 = vmax.f32 %v1147_v27, %v1159_v46  ;;  %1232 = vrot.lane.b32.xlu0 %v1214_v54, %s1923_s24 }
 0x347   : > { %v1203_v18 = vmax.f32 %v1167_v39, %v1197_v13 }
 0x349   : > { %v1209_v50 = vmax.f32 %v1203_v18, %v1137_v29 }
 0x34b   : > { %v1215_v22 = vsub.f32 %v1209_v50, %v1137_v29 }
 0x34c   : > { %v1691_v57 = vpop.permute.xlu1 %1690 }
 0x34d   : > { %1221 = vst [vmem:[#allocation2 + $0x18] sm:$0xff] %v1215_v22  ;;  %1234 = vrot.lane.b32.xlu1 %v1215_v22, %s1923_s24 }
 0x3b7   : > { %v1233_v58 = vpop.permute.xlu0 %1232 }
 0x3b8   : > { %v1238_v60 = vsel %vm1228_vm2, 0.0, %v1233_v58 }
 0x3b9   : > { %1240 = vst.msk [vmem:[%s2188_s9] sm:$0xff] %vm338_vm0, %v1238_v60 }
 0x3bf   : > { %v1235_v62 = vpop.permute.xlu1 %1234 }
 0x3c0   : > { %v1239_v2 = vsel %vm1229_vm3, 0.0, %v1235_v62 }
 0x3c1   : > { %1241 = vst.msk [vmem:[%s2188_s9 + $0x8] sm:$0xff] %vm338_vm0, %v1239_v2 }
 0x3c2 PF: > { %s1429_s8 = sshll.u32 %s1995_s28, 4  ;;  %s2679_s21 = sld [smem:[#allocation28_spill]] }
 0x3c3   : > { %s1258_s15 = sshll.u32 %s2188_s9, 4  ;;  %s1243_s13 = scalar_lea.sflag [#allocation7], %s274_s4  ;;  %s1259_s15 = int_to_ptr.vmem [resolvable:$true] %s1258_s15 }
 0x3c8   : > { %s1257_s3 = scalar_lea.hbm %s2679_s21, %s1429_s8  ;;  %s1821_s28 = scalar_lea.hbm %s2679_s21, 32 }
 0x3c9   : > { %s1260_s11 = sshll.u32 %s1257_s3, 4  ;;  %s1261_s11 = int_to_ptr.hbm [resolvable:$true] %s1260_s11 }
 0x3ca   : > { %s1815_s19 = sshra.s32 %s1261_s11, 4  ;;  %s1816_s19 = int_to_ptr.hbm [resolvable:$true] %s1815_s19 }
 0x3cb   : > { %s1817_s7 = scalar_lea.hbm %s1816_s19, 16  ;;  %p1822_p12 = scmp.lt.s32.totalorder %s1816_s19, %s2679_s21 }
 0x3cc   : > { %p1818_p7 = scmp.ne.s32.totalorder %s1816_s19, %s1817_s7  ;;  %p1823_p13 = scmp.lt.s32.totalorder %s1821_s28, %s1817_s7 }
 0x3ce   : > { %p1819_p10 = pnand %p1818_p7, %p2031_p11  ;;  %p1824_p3 = por %p1823_p13, %p1822_p12 }
 0x3d0   : > { %p1820_p4 = pneg %p1819_p10 }
 0x3d2   : > { %p1825_p5 = pnand %p1824_p3, %p1820_p4 }
 0x3d4   : > { %1828 = shalt.err (!%p1825_p5)
}
 0x3d5   : > { %s1924_s4 = smov 128   ;;  %s1925_s9 = smov 8  }
 0x3d6   : > { %1441 = dma.vmem_to_hbm [thread:$0]  (%p2031_p11), %s1259_s15, 256, %s1261_s11, %s1243_s13, %s1924_s4, %s1924_s4, %s1925_s9  }
 0x3d7 PF: > { %s2680_s22 = sld [smem:[#allocation18_spill]]  ;;  %p2683_p8 = scmp.ge.s32.totalorder %s1897_s27, 2 }
 0x3d8   : > { %s2681_s10 = sld [smem:[#allocation23_spill]] }
 0x3dd   : > { %s1278_s18 = sand.u32 1, %s2680_s22  }
 0x3de   : > { %p2682_p9 = scmp.ne.s32.totalorder %s2681_s10, 0  ;;  %s1279_s12 = scalar_lea.sflag [#allocation7], %s1278_s18 }
 0x3e0   : > { %p1456_p1 = pnand %p2683_p8, %p2682_p9 }
 0x3e2   : > { %p1457_p0 = pneg %p1456_p1 }
 0x3e4   : > { %1868 = dma.done.wait (%p1457_p0), %s1279_s12, 256  }
 0x3e5   : > { %1870 = vsyncadd (%p1457_p0), %s1279_s12, 4294967040  ;;  %s2684_s27 = sld [smem:[#allocation20_spill]]  ;;  %s2688_s22 = smov %s1877_s23 }
 0x3e6   : > { %s2685_s14 = sld [smem:[#allocation19_spill]]  ;;  %s2690_s25 = smov %s1889_s0 }
 0x3e7   : > { %s2686_s24 = sld [smem:[#allocation21_spill]]  ;;  %s2691_s0 = smov %s1893_s26 }
 0x3e8   : > { %s2687_s6 = sld [smem:[#allocation25_spill]] }
 0x3eb   : > { %p30_p11 = scmp.ge.s32.totalorder %s2684_s27, 4  }
 0x3ec   : > { %s2689_s23 = smov %s2685_s14 }
 0x3ed   :  { %32 = sbr.rel (!%p30_p11) target bundleno = 18 (0x12), region = 121 }
 0x3ee   : > { %s2692_s26 = smov %s2687_s6 }
 0x3f2   :  { %1291 = vsyncpa [#allocation6], 1 }
 0x3f3   :  { %1293 = vsyncpa [#allocation6 + $0x1], 1 }
 0x3f4   :  { %1294 = vsyncpa [#allocation9], 1 }
 0x3f5   :  { %1296 = vsyncpa [#allocation9 + $0x1], 1 }
 0x3f6   :  { %1297 = vsyncpa [#allocation7], 1 }
 0x3f7   :  { %1299 = vsyncpa [#allocation7 + $0x1], 1 }

</bundles_post_ra>
